<compile_context>
chip_gen: v7x
topology: tpu7x:2x2x1
jax: 0.10.0
libtpu: 0.0.40
codegen_flags: <defaults>
</compile_context>

<pallas_src>
import math
from functools import partial

import jax
import jax.numpy as jnp
from jax import lax
from jax.experimental import pallas as pl
from jax.experimental.pallas import tpu as pltpu

LN_EPS = 1e-6


def _layernorm(x, w, b):
    mu = jnp.mean(x, axis=-1, keepdims=True)
    var = jnp.mean((x - mu) ** 2, axis=-1, keepdims=True)
    return (x - mu) * lax.rsqrt(var + LN_EPS) * w + b


def _gelu_exact(x):
    # nn.GELU default (approximate='none'): 0.5 * x * (1 + erf(x / sqrt(2)))
    return 0.5 * x * (1.0 + lax.erf(x * (1.0 / math.sqrt(2.0))))


def _encoder_block_kernel(*args, num_heads, kv_from_tile):
    if kv_from_tile:
        (x_ref,
         ln1_w, ln1_b, w_q, b_q, w_kv, b_kv, w_o, b_o,
         ln2_w, ln2_b, w1, b1, w2, b2,
         o_ref, k_scr, v_scr, q_scr, ctx_scr) = args
        xkv_ref = None
    else:
        (x_ref, xkv_ref,
         ln1_w, ln1_b, w_q, b_q, w_kv, b_kv, w_o, b_o,
         ln2_w, ln2_b, w1, b1, w2, b2,
         o_ref, k_scr, v_scr, q_scr, ctx_scr) = args

    H = num_heads
    x_in = x_ref[0].astype(jnp.float32)              # (TS, E) query / residual tile
    TS, E = x_in.shape
    Dh = E // H

    # ---- LayerNorm 1 (f32, VPU) ----
    xn_q = _layernorm(x_in, ln1_w[...], ln1_b[...])  # (TS, E)

    # ---- K/V: built once per batch (first seq tile) into resident bf16 scratch ----
    @pl.when(pl.program_id(1) == 0)
    def _build_kv():
        if kv_from_tile:
            xn_kv = xn_q                              # TS == S: share LayerNorm-1
        else:
            xn_kv = _layernorm(xkv_ref[0].astype(jnp.float32), ln1_w[...], ln1_b[...])
        # One full-width (S,E)@(E,2E) matmul for K and V together.
        kv = jnp.dot(xn_kv.astype(jnp.bfloat16), w_kv[...],
                     preferred_element_type=jnp.float32) + b_kv[...]      # (S, 2E)
        kv = kv.astype(jnp.bfloat16)
        # Head-major relayout via static lane-slice stores (no jnp reshape/transpose).
        for h in range(H):
            k_scr[h] = kv[:, h * Dh:(h + 1) * Dh]
            v_scr[h] = kv[:, E + h * Dh:E + (h + 1) * Dh]

    # ---- Q projection: one full-width (TS,E)@(E,E); 1/sqrt(Dh) folded into w_q/b_q ----
    q2d = (jnp.dot(xn_q.astype(jnp.bfloat16), w_q[...],
                   preferred_element_type=jnp.float32) + b_q[...]).astype(jnp.bfloat16)
    for h in range(H):
        q_scr[h] = q2d[:, h * Dh:(h + 1) * Dh]

    # ---- Attention: head-batched bf16 MXU matmuls, f32 accumulation ----
    q = q_scr[...]                                    # (H, TS, Dh) bf16
    k = k_scr[...]                                    # (H, S,  Dh) bf16
    v = v_scr[...]                                    # (H, S,  Dh) bf16
    s = jnp.einsum("hqd,hkd->hqk", q, k, preferred_element_type=jnp.float32)
    s = s - jnp.max(s, axis=-1, keepdims=True)
    p = jnp.exp(s)
    p = p * pl.reciprocal(jnp.sum(p, axis=-1, keepdims=True), approx=True)
    ctx = jnp.einsum("hqk,hkd->hqd", p.astype(jnp.bfloat16), v,
                     preferred_element_type=jnp.float32)                  # (H, TS, Dh)

    # ---- Output projection: concat heads via scratch, then ONE (TS,E)@(E,E) dot ----
    ctx_bf = ctx.astype(jnp.bfloat16)
    for h in range(H):
        ctx_scr[:, h * Dh:(h + 1) * Dh] = ctx_bf[h]
    attn = jnp.dot(ctx_scr[...], w_o[...],
                   preferred_element_type=jnp.float32) + b_o[...]         # (TS, E)

    # dropout(attn) is identity in eval mode
    x1 = attn + x_in                                                      # first residual

    # ---- LayerNorm 2 + MLP (GELU exact / erf, torch nn.GELU default) ----
    yn = _layernorm(x1, ln2_w[...], ln2_b[...]).astype(jnp.bfloat16)
    h1 = jnp.dot(yn, w1[...], preferred_element_type=jnp.float32) + b1[...]
    h1 = _gelu_exact(h1)
    h2 = jnp.dot(h1.astype(jnp.bfloat16), w2[...],
                 preferred_element_type=jnp.float32) + b2[...]

    o_ref[0] = (x1 + h2).astype(o_ref.dtype)


def _prep_params(params, num_heads):
    """Host-side: torch-layout weights -> packed, matmul-ready bf16 layouts."""
    E = params["ln1_w"].shape[0]
    H = num_heads
    Dh = E // H
    scale = 1.0 / math.sqrt(Dh)

    w_in = params["in_proj_weight"]          # (3E, E): rows = output features
    b_in = params["in_proj_bias"]            # (3E,)

    return dict(
        ln1_w=params["ln1_w"][None, :].astype(jnp.float32),
        ln1_b=params["ln1_b"][None, :].astype(jnp.float32),
        # Q: (E_in, E_out), 1/sqrt(Dh) folded in; output column index = h*Dh + d.
        w_q=(w_in[:E] * scale).T.astype(jnp.bfloat16),                  # (E, E)
        b_q=(b_in[:E] * scale)[None, :].astype(jnp.float32),           # (1, E)
        # K and V packed side by side: output columns [0,E) = K, [E,2E) = V.
        w_kv=w_in[E:].T.astype(jnp.bfloat16),                          # (E, 2E)
        b_kv=b_in[E:][None, :].astype(jnp.float32),                    # (1, 2E)
        # Output projection: Wo^T so concat-heads (row index h*Dh+d) contracts directly.
        w_o=params["out_proj_weight"].T.astype(jnp.bfloat16),          # (E, E)
        b_o=params["out_proj_bias"][None, :].astype(jnp.float32),      # (1, E)
        ln2_w=params["ln2_w"][None, :].astype(jnp.float32),
        ln2_b=params["ln2_b"][None, :].astype(jnp.float32),
        w1=params["mlp_w1"].T.astype(jnp.bfloat16),                    # (E, M)
        b1=params["mlp_b1"][None, :].astype(jnp.float32),              # (1, M)
        w2=params["mlp_w2"].T.astype(jnp.bfloat16),                    # (M, E)
        b2=params["mlp_b2"][None, :].astype(jnp.float32),              # (1, E)
    )


def _vmem_capacity_bytes():
    """Physical per-core VMEM (128 MiB on v5e/v6e, 64 MiB on v7x)."""
    try:
        cap = int(getattr(pltpu.get_tpu_info(), "vmem_capacity_bytes", 0))
        if cap > 0:
            return cap
    except Exception:
        pass
    return 64 * 1024 * 1024   # conservative fallback, valid on every generation


def _choose_seq_tile(S, E, H, mlp_dim, vmem_cap):
    """Largest sequence tile whose f32 score block + activations fit the budget.

    The whole sequence is preferred (typical ViT, S <= ~1024): it removes the
    second x stream and all per-tile overhead.  For very long sequences a
    KV-tiled online-softmax inner loop would be the next step (not needed at
    ViT shapes).
    """
    budget = vmem_cap // 2    # the other half: weights, K/V scratch, pipelining

    def act_bytes(ts):
        return 4 * (2 * H * ts * S        # scores + probabilities (f32)
                    + ts * mlp_dim        # MLP hidden (f32)
                    + 6 * ts * E)         # misc (TS, E) f32 temporaries

    if act_bytes(S) <= budget:
        return S
    for ts in (1024, 512, 384, 256, 128, 64, 32, 16, 8):
        if S % ts == 0 and act_bytes(ts) <= budget:
            return ts
    return S


def _vmem_limit_bytes(vmem_cap, *, E, mlp_dim, H, S, TS, share_x):
    Dh = E // H
    weight = 2 * (4 * E * E + 2 * E * mlp_dim)                # resident bf16, one copy
    scratch = 2 * (2 * H * S * Dh + H * TS * Dh + TS * E)     # bf16 K/V/Q/ctx scratch
    tiles = 2 * 4 * (2 * TS * E + (0 if share_x else S * E))  # double-buffered f32 I/O
    temps = 4 * (2 * H * TS * S + TS * mlp_dim + 2 * S * E + 6 * TS * E)
    # 2x weight: default double-buffering (constant index maps => no re-DMA though).
    need = 2 * weight + scratch + tiles + temps + (4 << 20)
    ceiling = int(vmem_cap * 0.85)        # headroom for compiler-internal scratch
    return int(min(ceiling, max(32 << 20, need)))


def encoder_block(x, params, *, num_heads, seq_tile=None):
    """x: (B, S, E) float32. params: dict of weights in torch layouts."""
    B, S, E = x.shape
    H = num_heads
    assert E % H == 0, "hidden_dim must be divisible by num_heads"
    Dh = E // H
    mlp_dim = params["mlp_w1"].shape[0]

    p = _prep_params(params, H)
    vmem_cap = _vmem_capacity_bytes()

    TS = seq_tile if seq_tile is not None else _choose_seq_tile(S, E, H, mlp_dim, vmem_cap)
    assert S % TS == 0, "sequence tile must divide seq_length"
    n_seq = S // TS
    share_x = (n_seq == 1)     # TS == S: single x stream, LayerNorm-1 computed once

    kernel = partial(_encoder_block_kernel, num_heads=H, kv_from_tile=share_x)

    def const(shape):
        # Constant index map: block is DMA'd once and stays resident across the grid.
        return pl.BlockSpec(shape, lambda b, s: (0, 0))

    weight_specs = [
        const((1, E)), const((1, E)),              # ln1 w, b
        const((E, E)), const((1, E)),              # w_q,  b_q   (scale folded in)
        const((E, 2 * E)), const((1, 2 * E)),      # w_kv, b_kv  (K | V packed)
        const((E, E)), const((1, E)),              # w_o^T, b_o
        const((1, E)), const((1, E)),              # ln2 w, b
        const((E, mlp_dim)), const((1, mlp_dim)),  # mlp linear 1
        const((mlp_dim, E)), const((1, E)),        # mlp linear 2
    ]
    weights = (p["ln1_w"], p["ln1_b"], p["w_q"], p["b_q"], p["w_kv"], p["b_kv"],
               p["w_o"], p["b_o"], p["ln2_w"], p["ln2_b"],
               p["w1"], p["b1"], p["w2"], p["b2"])

    x_tile_spec = pl.BlockSpec((1, TS, E), lambda b, s: (b, s, 0))
    if share_x:
        in_specs = [x_tile_spec] + weight_specs
        inputs = (x,)
    else:
        # Full-sequence stream for K/V; constant seq index => fetched once per batch.
        in_specs = ([x_tile_spec, pl.BlockSpec((1, S, E), lambda b, s: (b, 0, 0))]
                    + weight_specs)
        inputs = (x, x)

    scratch_shapes = [
        pltpu.VMEM((H, S, Dh), jnp.bfloat16),    # K, head-major, resident per batch
        pltpu.VMEM((H, S, Dh), jnp.bfloat16),    # V, head-major, resident per batch
        pltpu.VMEM((H, TS, Dh), jnp.bfloat16),   # Q, head-major, per tile
        pltpu.VMEM((TS, E), jnp.bfloat16),       # concat-heads context, per tile
    ]

    vmem_limit = _vmem_limit_bytes(vmem_cap, E=E, mlp_dim=mlp_dim, H=H, S=S, TS=TS,
                                   share_x=share_x)

    return pl.pallas_call(
        kernel,
        out_shape=jax.ShapeDtypeStruct((B, S, E), x.dtype),
        grid_spec=pltpu.PrefetchScalarGridSpec(
            num_scalar_prefetch=0,
            grid=(B, n_seq),
            in_specs=in_specs,
            out_specs=pl.BlockSpec((1, TS, E), lambda b, s: (b, s, 0)),
            scratch_shapes=scratch_shapes,
        ),
        compiler_params=pltpu.CompilerParams(
            # K/V scratch is carried across the seq tiles of one batch -> "arbitrary";
            # batches are independent -> "parallel" (megacore / v7x dual-TC).
            dimension_semantics=("parallel", "arbitrary"),
            vmem_limit_bytes=vmem_limit,
        ),
    )(*inputs, *weights)


def init_params(key, hidden_dim, mlp_dim):
    """Deterministic synthetic parameters (torch layouts for linear weights)."""
    E, M = hidden_dim, mlp_dim
    ks = jax.random.split(key, 8)

    def xavier(k, fan_out, fan_in):
        bound = math.sqrt(6.0 / (fan_in + fan_out))
        return jax.random.uniform(k, (fan_out, fan_in), jnp.float32, -bound, bound)

    return {
        "ln1_w": jnp.ones((E,), jnp.float32),
        "ln1_b": jnp.zeros((E,), jnp.float32),
        "in_proj_weight": xavier(ks[0], 3 * E, E),                    # (3E, E)
        "in_proj_bias": 0.02 * jax.random.normal(ks[1], (3 * E,), jnp.float32),
        "out_proj_weight": xavier(ks[2], E, E),                       # (E, E)
        "out_proj_bias": 0.02 * jax.random.normal(ks[3], (E,), jnp.float32),
        "ln2_w": jnp.ones((E,), jnp.float32),
        "ln2_b": jnp.zeros((E,), jnp.float32),
        "mlp_w1": xavier(ks[4], M, E),                                # (M, E)
        "mlp_b1": 1e-6 * jax.random.normal(ks[5], (M,), jnp.float32),
        "mlp_w2": xavier(ks[6], E, M),                                # (E, M)
        "mlp_b2": 1e-6 * jax.random.normal(ks[7], (E,), jnp.float32),
    }


def _reference(x, p, num_heads):
    """Pure-JAX f32 reference of the same forward (sanity check)."""
    B, S, E = x.shape
    Dh = E // num_heads

    def ln(v, w, b):
        mu = jnp.mean(v, -1, keepdims=True)
        var = jnp.mean((v - mu) ** 2, -1, keepdims=True)
        return (v - mu) / jnp.sqrt(var + LN_EPS) * w + b

    xn = ln(x, p["ln1_w"], p["ln1_b"])
    qkv = xn @ p["in_proj_weight"].T + p["in_proj_bias"]
    q, k, v = jnp.split(qkv, 3, axis=-1)
    q = q.reshape(B, S, num_heads, Dh).transpose(0, 2, 1, 3)
    k = k.reshape(B, S, num_heads, Dh).transpose(0, 2, 1, 3)
    v = v.reshape(B, S, num_heads, Dh).transpose(0, 2, 1, 3)
    s = jnp.einsum("bhqd,bhkd->bhqk", q, k) / math.sqrt(Dh)
    pw = jax.nn.softmax(s, axis=-1)
    a = jnp.einsum("bhqk,bhkd->bhqd", pw, v).transpose(0, 2, 1, 3).reshape(B, S, E)
    a = a @ p["out_proj_weight"].T + p["out_proj_bias"]
    x1 = a + x
    y = ln(x1, p["ln2_w"], p["ln2_b"])
    y = jax.nn.gelu(y @ p["mlp_w1"].T + p["mlp_b1"], approximate=False)
    y = y @ p["mlp_w2"].T + p["mlp_b2"]
    return x1 + y


if __name__ == "__main__":
    # Small shapes consistent with the module's forward: (batch, seq, hidden)
    B, E = 2, 32
    NUM_HEADS = 4
    MLP_DIM = 64

    key = jax.random.PRNGKey(0)
    kx1, kx2, kp = jax.random.split(key, 3)
    params = init_params(kp, E, MLP_DIM)

    # Path 1: whole-sequence tile (TS == S) — the common ViT case (single x
    # stream, LayerNorm-1 computed once for Q and K/V).
    x1 = jax.random.normal(kx1, (B, 8, E), jnp.float32)
    out1 = jax.block_until_ready(encoder_block(x1, params, num_heads=NUM_HEADS))
    ref1 = _reference(x1, params, NUM_HEADS)
    assert out1.shape == x1.shape
    err1 = float(jnp.max(jnp.abs(out1 - ref1)))
    # bf16 MXU operands with f32 accumulation vs a pure-f32 reference.
    assert jnp.allclose(out1, ref1, atol=5e-2, rtol=5e-2), err1

    # Path 2: sequence tiling (S=16, TS=8) — exercises per-batch K/V residency
    # in VMEM scratch and the "arbitrary" seq grid axis.
    x2 = jax.random.normal(kx2, (B, 16, E), jnp.float32)
    out2 = jax.block_until_ready(
        encoder_block(x2, params, num_heads=NUM_HEADS, seq_tile=8))
    ref2 = _reference(x2, params, NUM_HEADS)
    err2 = float(jnp.max(jnp.abs(out2 - ref2)))
    assert jnp.allclose(out2, ref2, atol=5e-2, rtol=5e-2), err2

    print("KERNEL_OK")
</pallas_src>

<mosaic_0001>
module attributes {stable_mosaic.version = 11 : i64} {
  func.func @_encoder_block_kernel(%arg0: i32, %arg1: i32, %arg2: memref<1x8x32xf32, #tpu.memory_space<vmem>>, %arg3: memref<1x32xf32, #tpu.memory_space<vmem>>, %arg4: memref<1x32xf32, #tpu.memory_space<vmem>>, %arg5: memref<32x32xbf16, #tpu.memory_space<vmem>>, %arg6: memref<1x32xf32, #tpu.memory_space<vmem>>, %arg7: memref<32x64xbf16, #tpu.memory_space<vmem>>, %arg8: memref<1x64xf32, #tpu.memory_space<vmem>>, %arg9: memref<32x32xbf16, #tpu.memory_space<vmem>>, %arg10: memref<1x32xf32, #tpu.memory_space<vmem>>, %arg11: memref<1x32xf32, #tpu.memory_space<vmem>>, %arg12: memref<1x32xf32, #tpu.memory_space<vmem>>, %arg13: memref<32x64xbf16, #tpu.memory_space<vmem>>, %arg14: memref<1x64xf32, #tpu.memory_space<vmem>>, %arg15: memref<64x32xbf16, #tpu.memory_space<vmem>>, %arg16: memref<1x32xf32, #tpu.memory_space<vmem>>, %arg17: memref<1x8x32xf32, #tpu.memory_space<vmem>>, %arg18: memref<4x8x8xbf16, #tpu.memory_space<vmem>>, %arg19: memref<4x8x8xbf16, #tpu.memory_space<vmem>>, %arg20: memref<4x8x8xbf16, #tpu.memory_space<vmem>>, %arg21: memref<8x32xbf16, #tpu.memory_space<vmem>>) attributes {dimension_semantics = [#tpu.dimension_semantics<parallel>, #tpu.dimension_semantics<arbitrary>], iteration_bounds = array<i64: 2, 1>, scalar_prefetch = 0 : i64, scratch_operands = 4 : i64, tpu.core_type = #tpu.core_type<tc>, window_params = [{transform_indices = @transform_0, window_bounds = array<i64: 1, 8, 32>}, {pipeline_mode = #tpu.pipeline_mode<synchronous>, transform_indices = @transform_1, window_bounds = array<i64: 1, 32>}, {pipeline_mode = #tpu.pipeline_mode<synchronous>, transform_indices = @transform_2, window_bounds = array<i64: 1, 32>}, {pipeline_mode = #tpu.pipeline_mode<synchronous>, transform_indices = @transform_3, window_bounds = array<i64: 32, 32>}, {pipeline_mode = #tpu.pipeline_mode<synchronous>, transform_indices = @transform_4, window_bounds = array<i64: 1, 32>}, {pipeline_mode = #tpu.pipeline_mode<synchronous>, transform_indices = @transform_5, window_bounds = array<i64: 32, 64>}, {pipeline_mode = #tpu.pipeline_mode<synchronous>, transform_indices = @transform_6, window_bounds = array<i64: 1, 64>}, {pipeline_mode = #tpu.pipeline_mode<synchronous>, transform_indices = @transform_7, window_bounds = array<i64: 32, 32>}, {pipeline_mode = #tpu.pipeline_mode<synchronous>, transform_indices = @transform_8, window_bounds = array<i64: 1, 32>}, {pipeline_mode = #tpu.pipeline_mode<synchronous>, transform_indices = @transform_9, window_bounds = array<i64: 1, 32>}, {pipeline_mode = #tpu.pipeline_mode<synchronous>, transform_indices = @transform_10, window_bounds = array<i64: 1, 32>}, {pipeline_mode = #tpu.pipeline_mode<synchronous>, transform_indices = @transform_11, window_bounds = array<i64: 32, 64>}, {pipeline_mode = #tpu.pipeline_mode<synchronous>, transform_indices = @transform_12, window_bounds = array<i64: 1, 64>}, {pipeline_mode = #tpu.pipeline_mode<synchronous>, transform_indices = @transform_13, window_bounds = array<i64: 64, 32>}, {pipeline_mode = #tpu.pipeline_mode<synchronous>, transform_indices = @transform_14, window_bounds = array<i64: 1, 32>}, {transform_indices = @transform_15, window_bounds = array<i64: 1, 8, 32>}]} {
    %c0 = arith.constant 0 : index
    %c0_0 = arith.constant 0 : index
    %c0_1 = arith.constant 0 : index
    %0 = vector.load %arg2[%c0, %c0_0, %c0_1] : memref<1x8x32xf32, #tpu.memory_space<vmem>>, vector<1x8x32xf32>
    %1 = vector.shape_cast %0 : vector<1x8x32xf32> to vector<8x32xf32>
    %c0_2 = arith.constant 0 : index
    %c0_3 = arith.constant 0 : index
    %2 = vector.load %arg3[%c0_2, %c0_3] : memref<1x32xf32, #tpu.memory_space<vmem>>, vector<1x32xf32>
    %c0_4 = arith.constant 0 : index
    %c0_5 = arith.constant 0 : index
    %3 = vector.load %arg4[%c0_4, %c0_5] : memref<1x32xf32, #tpu.memory_space<vmem>>, vector<1x32xf32>
    %cst = arith.constant dense<0.000000e+00> : vector<8xf32>
    %4 = vector.multi_reduction <add>, %1, %cst [1] : vector<8x32xf32> to vector<8xf32>
    %5 = vector.shape_cast %4 : vector<8xf32> to vector<8x1xf32>
    %cst_6 = arith.constant 3.200000e+01 : f32
    %6 = vector.broadcast %cst_6 : f32 to vector<8x1xf32>
    %7 = arith.divf %5, %6 : vector<8x1xf32>
    %8 = vector.broadcast %7 : vector<8x1xf32> to vector<8x32xf32>
    %9 = arith.subf %1, %8 : vector<8x32xf32>
    %10 = arith.mulf %9, %9 : vector<8x32xf32>
    %cst_7 = arith.constant dense<0.000000e+00> : vector<8xf32>
    %11 = vector.multi_reduction <add>, %10, %cst_7 [1] : vector<8x32xf32> to vector<8xf32>
    %12 = vector.shape_cast %11 : vector<8xf32> to vector<8x1xf32>
    %cst_8 = arith.constant 3.200000e+01 : f32
    %13 = vector.broadcast %cst_8 : f32 to vector<8x1xf32>
    %14 = arith.divf %12, %13 : vector<8x1xf32>
    %15 = vector.broadcast %7 : vector<8x1xf32> to vector<8x32xf32>
    %16 = arith.subf %1, %15 : vector<8x32xf32>
    %cst_9 = arith.constant 9.99999997E-7 : f32
    %17 = vector.broadcast %cst_9 : f32 to vector<8x1xf32>
    %18 = arith.addf %14, %17 : vector<8x1xf32>
    %19 = math.rsqrt %18 : vector<8x1xf32>
    %20 = vector.broadcast %19 : vector<8x1xf32> to vector<8x32xf32>
    %21 = arith.mulf %16, %20 : vector<8x32xf32>
    %22 = vector.broadcast %2 : vector<1x32xf32> to vector<8x32xf32>
    %23 = arith.mulf %21, %22 : vector<8x32xf32>
    %24 = vector.broadcast %3 : vector<1x32xf32> to vector<8x32xf32>
    %25 = arith.addf %23, %24 : vector<8x32xf32>
    %c0_i32 = arith.constant 0 : i32
    %26 = arith.cmpi eq, %arg1, %c0_i32 : i32
    %27 = arith.extui %26 : i1 to i32
    %c0_i32_10 = arith.constant 0 : i32
    %28 = arith.cmpi ne, %27, %c0_i32_10 : i32
    scf.if %28 {
      %136 = arith.truncf %25 : vector<8x32xf32> to vector<8x32xbf16>
      %c0_75 = arith.constant 0 : index
      %c0_76 = arith.constant 0 : index
      %137 = vector.load %arg7[%c0_75, %c0_76] : memref<32x64xbf16, #tpu.memory_space<vmem>>, vector<32x64xbf16>
      %cst_77 = arith.constant dense<0.000000e+00> : vector<8x64xf32>
      %138 = tpu.matmul %136, %137, %cst_77 {dimension_numbers = #tpu.dot_dimension_numbers<[1], [0], [0], [1], [0, 0, 1, 1], [], []>} : vector<8x32xbf16>, vector<32x64xbf16>, vector<8x64xf32> -> vector<8x64xf32>
      %c0_78 = arith.constant 0 : index
      %c0_79 = arith.constant 0 : index
      %139 = vector.load %arg8[%c0_78, %c0_79] : memref<1x64xf32, #tpu.memory_space<vmem>>, vector<1x64xf32>
      %140 = vector.broadcast %139 : vector<1x64xf32> to vector<8x64xf32>
      %141 = arith.addf %138, %140 : vector<8x64xf32>
      %142 = arith.truncf %141 : vector<8x64xf32> to vector<8x64xbf16>
      %143 = vector.extract_strided_slice %142 {offsets = [0, 0], sizes = [8, 8], strides = [1, 1]} : vector<8x64xbf16> to vector<8x8xbf16>
      %c0_80 = arith.constant 0 : index
      %c0_81 = arith.constant 0 : index
      %c0_82 = arith.constant 0 : index
      %144 = vector.load %arg18[%c0_80, %c0_81, %c0_82] : memref<4x8x8xbf16, #tpu.memory_space<vmem>>, vector<1x8x8xbf16>
      %145 = vector.shape_cast %144 : vector<1x8x8xbf16> to vector<8x8xbf16>
      %146 = vector.shape_cast %143 : vector<8x8xbf16> to vector<1x8x8xbf16>
      tpu.vector_store %arg18[%c0_80, %c0_81, %c0_82], %146 {strides = array<i32>} : memref<4x8x8xbf16, #tpu.memory_space<vmem>>, vector<1x8x8xbf16>,
      %147 = vector.extract_strided_slice %142 {offsets = [0, 32], sizes = [8, 8], strides = [1, 1]} : vector<8x64xbf16> to vector<8x8xbf16>
      %c0_83 = arith.constant 0 : index
      %c0_84 = arith.constant 0 : index
      %c0_85 = arith.constant 0 : index
      %148 = vector.load %arg19[%c0_83, %c0_84, %c0_85] : memref<4x8x8xbf16, #tpu.memory_space<vmem>>, vector<1x8x8xbf16>
      %149 = vector.shape_cast %148 : vector<1x8x8xbf16> to vector<8x8xbf16>
      %150 = vector.shape_cast %147 : vector<8x8xbf16> to vector<1x8x8xbf16>
      tpu.vector_store %arg19[%c0_83, %c0_84, %c0_85], %150 {strides = array<i32>} : memref<4x8x8xbf16, #tpu.memory_space<vmem>>, vector<1x8x8xbf16>,
      %151 = vector.extract_strided_slice %142 {offsets = [0, 8], sizes = [8, 8], strides = [1, 1]} : vector<8x64xbf16> to vector<8x8xbf16>
      %c1_86 = arith.constant 1 : index
      %c0_87 = arith.constant 0 : index
      %c0_88 = arith.constant 0 : index
      %152 = vector.load %arg18[%c1_86, %c0_87, %c0_88] : memref<4x8x8xbf16, #tpu.memory_space<vmem>>, vector<1x8x8xbf16>
      %153 = vector.shape_cast %152 : vector<1x8x8xbf16> to vector<8x8xbf16>
      %154 = vector.shape_cast %151 : vector<8x8xbf16> to vector<1x8x8xbf16>
      tpu.vector_store %arg18[%c1_86, %c0_87, %c0_88], %154 {strides = array<i32>} : memref<4x8x8xbf16, #tpu.memory_space<vmem>>, vector<1x8x8xbf16>,
      %155 = vector.extract_strided_slice %142 {offsets = [0, 40], sizes = [8, 8], strides = [1, 1]} : vector<8x64xbf16> to vector<8x8xbf16>
      %c1_89 = arith.constant 1 : index
      %c0_90 = arith.constant 0 : index
      %c0_91 = arith.constant 0 : index
      %156 = vector.load %arg19[%c1_89, %c0_90, %c0_91] : memref<4x8x8xbf16, #tpu.memory_space<vmem>>, vector<1x8x8xbf16>
      %157 = vector.shape_cast %156 : vector<1x8x8xbf16> to vector<8x8xbf16>
      %158 = vector.shape_cast %155 : vector<8x8xbf16> to vector<1x8x8xbf16>
      tpu.vector_store %arg19[%c1_89, %c0_90, %c0_91], %158 {strides = array<i32>} : memref<4x8x8xbf16, #tpu.memory_space<vmem>>, vector<1x8x8xbf16>,
      %159 = vector.extract_strided_slice %142 {offsets = [0, 16], sizes = [8, 8], strides = [1, 1]} : vector<8x64xbf16> to vector<8x8xbf16>
      %c2_92 = arith.constant 2 : index
      %c0_93 = arith.constant 0 : index
      %c0_94 = arith.constant 0 : index
      %160 = vector.load %arg18[%c2_92, %c0_93, %c0_94] : memref<4x8x8xbf16, #tpu.memory_space<vmem>>, vector<1x8x8xbf16>
      %161 = vector.shape_cast %160 : vector<1x8x8xbf16> to vector<8x8xbf16>
      %162 = vector.shape_cast %159 : vector<8x8xbf16> to vector<1x8x8xbf16>
      tpu.vector_store %arg18[%c2_92, %c0_93, %c0_94], %162 {strides = array<i32>} : memref<4x8x8xbf16, #tpu.memory_space<vmem>>, vector<1x8x8xbf16>,
      %163 = vector.extract_strided_slice %142 {offsets = [0, 48], sizes = [8, 8], strides = [1, 1]} : vector<8x64xbf16> to vector<8x8xbf16>
      %c2_95 = arith.constant 2 : index
      %c0_96 = arith.constant 0 : index
      %c0_97 = arith.constant 0 : index
      %164 = vector.load %arg19[%c2_95, %c0_96, %c0_97] : memref<4x8x8xbf16, #tpu.memory_space<vmem>>, vector<1x8x8xbf16>
      %165 = vector.shape_cast %164 : vector<1x8x8xbf16> to vector<8x8xbf16>
      %166 = vector.shape_cast %163 : vector<8x8xbf16> to vector<1x8x8xbf16>
      tpu.vector_store %arg19[%c2_95, %c0_96, %c0_97], %166 {strides = array<i32>} : memref<4x8x8xbf16, #tpu.memory_space<vmem>>, vector<1x8x8xbf16>,
      %167 = vector.extract_strided_slice %142 {offsets = [0, 24], sizes = [8, 8], strides = [1, 1]} : vector<8x64xbf16> to vector<8x8xbf16>
      %c3_98 = arith.constant 3 : index
      %c0_99 = arith.constant 0 : index
      %c0_100 = arith.constant 0 : index
      %168 = vector.load %arg18[%c3_98, %c0_99, %c0_100] : memref<4x8x8xbf16, #tpu.memory_space<vmem>>, vector<1x8x8xbf16>
      %169 = vector.shape_cast %168 : vector<1x8x8xbf16> to vector<8x8xbf16>
      %170 = vector.shape_cast %167 : vector<8x8xbf16> to vector<1x8x8xbf16>
      tpu.vector_store %arg18[%c3_98, %c0_99, %c0_100], %170 {strides = array<i32>} : memref<4x8x8xbf16, #tpu.memory_space<vmem>>, vector<1x8x8xbf16>,
      %171 = vector.extract_strided_slice %142 {offsets = [0, 56], sizes = [8, 8], strides = [1, 1]} : vector<8x64xbf16> to vector<8x8xbf16>
      %c3_101 = arith.constant 3 : index
      %c0_102 = arith.constant 0 : index
      %c0_103 = arith.constant 0 : index
      %172 = vector.load %arg19[%c3_101, %c0_102, %c0_103] : memref<4x8x8xbf16, #tpu.memory_space<vmem>>, vector<1x8x8xbf16>
      %173 = vector.shape_cast %172 : vector<1x8x8xbf16> to vector<8x8xbf16>
      %174 = vector.shape_cast %171 : vector<8x8xbf16> to vector<1x8x8xbf16>
      tpu.vector_store %arg19[%c3_101, %c0_102, %c0_103], %174 {strides = array<i32>} : memref<4x8x8xbf16, #tpu.memory_space<vmem>>, vector<1x8x8xbf16>,
    } else {
    }
    %29 = arith.truncf %25 : vector<8x32xf32> to vector<8x32xbf16>
    %c0_11 = arith.constant 0 : index
    %c0_12 = arith.constant 0 : index
    %30 = vector.load %arg5[%c0_11, %c0_12] : memref<32x32xbf16, #tpu.memory_space<vmem>>, vector<32x32xbf16>
    %cst_13 = arith.constant dense<0.000000e+00> : vector<8x32xf32>
    %31 = tpu.matmul %29, %30, %cst_13 {dimension_numbers = #tpu.dot_dimension_numbers<[1], [0], [0], [1], [0, 0, 1, 1], [], []>} : vector<8x32xbf16>, vector<32x32xbf16>, vector<8x32xf32> -> vector<8x32xf32>
    %c0_14 = arith.constant 0 : index
    %c0_15 = arith.constant 0 : index
    %32 = vector.load %arg6[%c0_14, %c0_15] : memref<1x32xf32, #tpu.memory_space<vmem>>, vector<1x32xf32>
    %33 = vector.broadcast %32 : vector<1x32xf32> to vector<8x32xf32>
    %34 = arith.addf %31, %33 : vector<8x32xf32>
    %35 = arith.truncf %34 : vector<8x32xf32> to vector<8x32xbf16>
    %36 = vector.extract_strided_slice %35 {offsets = [0, 0], sizes = [8, 8], strides = [1, 1]} : vector<8x32xbf16> to vector<8x8xbf16>
    %c0_16 = arith.constant 0 : index
    %c0_17 = arith.constant 0 : index
    %c0_18 = arith.constant 0 : index
    %37 = vector.load %arg20[%c0_16, %c0_17, %c0_18] : memref<4x8x8xbf16, #tpu.memory_space<vmem>>, vector<1x8x8xbf16>
    %38 = vector.shape_cast %37 : vector<1x8x8xbf16> to vector<8x8xbf16>
    %39 = vector.shape_cast %36 : vector<8x8xbf16> to vector<1x8x8xbf16>
    tpu.vector_store %arg20[%c0_16, %c0_17, %c0_18], %39 {strides = array<i32>} : memref<4x8x8xbf16, #tpu.memory_space<vmem>>, vector<1x8x8xbf16>,
    %40 = vector.extract_strided_slice %35 {offsets = [0, 8], sizes = [8, 8], strides = [1, 1]} : vector<8x32xbf16> to vector<8x8xbf16>
    %c1 = arith.constant 1 : index
    %c0_19 = arith.constant 0 : index
    %c0_20 = arith.constant 0 : index
    %41 = vector.load %arg20[%c1, %c0_19, %c0_20] : memref<4x8x8xbf16, #tpu.memory_space<vmem>>, vector<1x8x8xbf16>
    %42 = vector.shape_cast %41 : vector<1x8x8xbf16> to vector<8x8xbf16>
    %43 = vector.shape_cast %40 : vector<8x8xbf16> to vector<1x8x8xbf16>
    tpu.vector_store %arg20[%c1, %c0_19, %c0_20], %43 {strides = array<i32>} : memref<4x8x8xbf16, #tpu.memory_space<vmem>>, vector<1x8x8xbf16>,
    %44 = vector.extract_strided_slice %35 {offsets = [0, 16], sizes = [8, 8], strides = [1, 1]} : vector<8x32xbf16> to vector<8x8xbf16>
    %c2 = arith.constant 2 : index
    %c0_21 = arith.constant 0 : index
    %c0_22 = arith.constant 0 : index
    %45 = vector.load %arg20[%c2, %c0_21, %c0_22] : memref<4x8x8xbf16, #tpu.memory_space<vmem>>, vector<1x8x8xbf16>
    %46 = vector.shape_cast %45 : vector<1x8x8xbf16> to vector<8x8xbf16>
    %47 = vector.shape_cast %44 : vector<8x8xbf16> to vector<1x8x8xbf16>
    tpu.vector_store %arg20[%c2, %c0_21, %c0_22], %47 {strides = array<i32>} : memref<4x8x8xbf16, #tpu.memory_space<vmem>>, vector<1x8x8xbf16>,
    %48 = vector.extract_strided_slice %35 {offsets = [0, 24], sizes = [8, 8], strides = [1, 1]} : vector<8x32xbf16> to vector<8x8xbf16>
    %c3 = arith.constant 3 : index
    %c0_23 = arith.constant 0 : index
    %c0_24 = arith.constant 0 : index
    %49 = vector.load %arg20[%c3, %c0_23, %c0_24] : memref<4x8x8xbf16, #tpu.memory_space<vmem>>, vector<1x8x8xbf16>
    %50 = vector.shape_cast %49 : vector<1x8x8xbf16> to vector<8x8xbf16>
    %51 = vector.shape_cast %48 : vector<8x8xbf16> to vector<1x8x8xbf16>
    tpu.vector_store %arg20[%c3, %c0_23, %c0_24], %51 {strides = array<i32>} : memref<4x8x8xbf16, #tpu.memory_space<vmem>>, vector<1x8x8xbf16>,
    %c0_25 = arith.constant 0 : index
    %c0_26 = arith.constant 0 : index
    %c0_27 = arith.constant 0 : index
    %52 = vector.load %arg20[%c0_25, %c0_26, %c0_27] : memref<4x8x8xbf16, #tpu.memory_space<vmem>>, vector<4x8x8xbf16>
    %c0_28 = arith.constant 0 : index
    %c0_29 = arith.constant 0 : index
    %c0_30 = arith.constant 0 : index
    %53 = vector.load %arg18[%c0_28, %c0_29, %c0_30] : memref<4x8x8xbf16, #tpu.memory_space<vmem>>, vector<4x8x8xbf16>
    %c0_31 = arith.constant 0 : index
    %c0_32 = arith.constant 0 : index
    %c0_33 = arith.constant 0 : index
    %54 = vector.load %arg19[%c0_31, %c0_32, %c0_33] : memref<4x8x8xbf16, #tpu.memory_space<vmem>>, vector<4x8x8xbf16>
    "tpu.trace_start"() <{level = 10 : i32, message = "hqd,hkd->hqk"}> : () -> ()
    %cst_34 = arith.constant dense<0.000000e+00> : vector<4x8x8xf32>
    %55 = tpu.matmul %52, %53, %cst_34 {dimension_numbers = #tpu.dot_dimension_numbers<[2], [2], [1], [1], [0, 0, 0, 1, 1, 1], [0], [0]>} : vector<4x8x8xbf16>, vector<4x8x8xbf16>, vector<4x8x8xf32> -> vector<4x8x8xf32>
    "tpu.trace_stop"() : () -> ()
    %cst_35 = arith.constant dense<0xFF800000> : vector<4x8xf32>
    %56 = vector.multi_reduction <maximumf>, %55, %cst_35 [2] : vector<4x8x8xf32> to vector<4x8xf32>
    %57 = vector.shape_cast %56 : vector<4x8xf32> to vector<4x8x1xf32>
    %58 = vector.broadcast %57 : vector<4x8x1xf32> to vector<4x8x8xf32>
    %59 = arith.subf %55, %58 : vector<4x8x8xf32>
    %60 = math.exp %59 : vector<4x8x8xf32>
    %cst_36 = arith.constant dense<0.000000e+00> : vector<4x8xf32>
    %61 = vector.multi_reduction <add>, %60, %cst_36 [2] : vector<4x8x8xf32> to vector<4x8xf32>
    %62 = vector.shape_cast %61 : vector<4x8xf32> to vector<4x8x1xf32>
    %63 = tpu.reciprocal %62 {approx = true} : vector<4x8x1xf32> -> vector<4x8x1xf32>
    %64 = vector.broadcast %63 : vector<4x8x1xf32> to vector<4x8x8xf32>
    %65 = arith.mulf %60, %64 : vector<4x8x8xf32>
    %66 = arith.truncf %65 : vector<4x8x8xf32> to vector<4x8x8xbf16>
    "tpu.trace_start"() <{level = 10 : i32, message = "hqk,hkd->hqd"}> : () -> ()
    %cst_37 = arith.constant dense<0.000000e+00> : vector<4x8x8xf32>
    %67 = tpu.matmul %66, %54, %cst_37 {dimension_numbers = #tpu.dot_dimension_numbers<[2], [1], [1], [2], [0, 0, 0, 1, 1, 2], [0], [0]>} : vector<4x8x8xbf16>, vector<4x8x8xbf16>, vector<4x8x8xf32> -> vector<4x8x8xf32>
    "tpu.trace_stop"() : () -> ()
    %68 = arith.truncf %67 : vector<4x8x8xf32> to vector<4x8x8xbf16>
    %69 = vector.extract_strided_slice %68 {offsets = [0, 0, 0], sizes = [1, 8, 8], strides = [1, 1, 1]} : vector<4x8x8xbf16> to vector<1x8x8xbf16>
    %70 = vector.shape_cast %69 : vector<1x8x8xbf16> to vector<8x8xbf16>
    %c0_38 = arith.constant 0 : index
    %c0_39 = arith.constant 0 : index
    %71 = vector.load %arg21[%c0_38, %c0_39] : memref<8x32xbf16, #tpu.memory_space<vmem>>, vector<8x8xbf16>
    tpu.vector_store %arg21[%c0_38, %c0_39], %70 {strides = array<i32>} : memref<8x32xbf16, #tpu.memory_space<vmem>>, vector<8x8xbf16>,
    %72 = vector.extract_strided_slice %68 {offsets = [1, 0, 0], sizes = [1, 8, 8], strides = [1, 1, 1]} : vector<4x8x8xbf16> to vector<1x8x8xbf16>
    %73 = vector.shape_cast %72 : vector<1x8x8xbf16> to vector<8x8xbf16>
    %c0_40 = arith.constant 0 : index
    %c8 = arith.constant 8 : index
    %74 = vector.load %arg21[%c0_40, %c8] : memref<8x32xbf16, #tpu.memory_space<vmem>>, vector<8x8xbf16>
    tpu.vector_store %arg21[%c0_40, %c8], %73 {strides = array<i32>} : memref<8x32xbf16, #tpu.memory_space<vmem>>, vector<8x8xbf16>,
    %75 = vector.extract_strided_slice %68 {offsets = [2, 0, 0], sizes = [1, 8, 8], strides = [1, 1, 1]} : vector<4x8x8xbf16> to vector<1x8x8xbf16>
    %76 = vector.shape_cast %75 : vector<1x8x8xbf16> to vector<8x8xbf16>
    %c0_41 = arith.constant 0 : index
    %c16 = arith.constant 16 : index
    %77 = vector.load %arg21[%c0_41, %c16] : memref<8x32xbf16, #tpu.memory_space<vmem>>, vector<8x8xbf16>
    tpu.vector_store %arg21[%c0_41, %c16], %76 {strides = array<i32>} : memref<8x32xbf16, #tpu.memory_space<vmem>>, vector<8x8xbf16>,
    %78 = vector.extract_strided_slice %68 {offsets = [3, 0, 0], sizes = [1, 8, 8], strides = [1, 1, 1]} : vector<4x8x8xbf16> to vector<1x8x8xbf16>
    %79 = vector.shape_cast %78 : vector<1x8x8xbf16> to vector<8x8xbf16>
    %c0_42 = arith.constant 0 : index
    %c24 = arith.constant 24 : index
    %80 = vector.load %arg21[%c0_42, %c24] : memref<8x32xbf16, #tpu.memory_space<vmem>>, vector<8x8xbf16>
    tpu.vector_store %arg21[%c0_42, %c24], %79 {strides = array<i32>} : memref<8x32xbf16, #tpu.memory_space<vmem>>, vector<8x8xbf16>,
    %c0_43 = arith.constant 0 : index
    %c0_44 = arith.constant 0 : index
    %81 = vector.load %arg21[%c0_43, %c0_44] : memref<8x32xbf16, #tpu.memory_space<vmem>>, vector<8x32xbf16>
    %c0_45 = arith.constant 0 : index
    %c0_46 = arith.constant 0 : index
    %82 = vector.load %arg9[%c0_45, %c0_46] : memref<32x32xbf16, #tpu.memory_space<vmem>>, vector<32x32xbf16>
    %cst_47 = arith.constant dense<0.000000e+00> : vector<8x32xf32>
    %83 = tpu.matmul %81, %82, %cst_47 {dimension_numbers = #tpu.dot_dimension_numbers<[1], [0], [0], [1], [0, 0, 1, 1], [], []>} : vector<8x32xbf16>, vector<32x32xbf16>, vector<8x32xf32> -> vector<8x32xf32>
    %c0_48 = arith.constant 0 : index
    %c0_49 = arith.constant 0 : index
    %84 = vector.load %arg10[%c0_48, %c0_49] : memref<1x32xf32, #tpu.memory_space<vmem>>, vector<1x32xf32>
    %85 = vector.broadcast %84 : vector<1x32xf32> to vector<8x32xf32>
    %86 = arith.addf %83, %85 : vector<8x32xf32>
    %87 = arith.addf %86, %1 : vector<8x32xf32>
    %c0_50 = arith.constant 0 : index
    %c0_51 = arith.constant 0 : index
    %88 = vector.load %arg11[%c0_50, %c0_51] : memref<1x32xf32, #tpu.memory_space<vmem>>, vector<1x32xf32>
    %c0_52 = arith.constant 0 : index
    %c0_53 = arith.constant 0 : index
    %89 = vector.load %arg12[%c0_52, %c0_53] : memref<1x32xf32, #tpu.memory_space<vmem>>, vector<1x32xf32>
    %cst_54 = arith.constant dense<0.000000e+00> : vector<8xf32>
    %90 = vector.multi_reduction <add>, %87, %cst_54 [1] : vector<8x32xf32> to vector<8xf32>
    %91 = vector.shape_cast %90 : vector<8xf32> to vector<8x1xf32>
    %cst_55 = arith.constant 3.200000e+01 : f32
    %92 = vector.broadcast %cst_55 : f32 to vector<8x1xf32>
    %93 = arith.divf %91, %92 : vector<8x1xf32>
    %94 = vector.broadcast %93 : vector<8x1xf32> to vector<8x32xf32>
    %95 = arith.subf %87, %94 : vector<8x32xf32>
    %96 = arith.mulf %95, %95 : vector<8x32xf32>
    %cst_56 = arith.constant dense<0.000000e+00> : vector<8xf32>
    %97 = vector.multi_reduction <add>, %96, %cst_56 [1] : vector<8x32xf32> to vector<8xf32>
    %98 = vector.shape_cast %97 : vector<8xf32> to vector<8x1xf32>
    %cst_57 = arith.constant 3.200000e+01 : f32
    %99 = vector.broadcast %cst_57 : f32 to vector<8x1xf32>
    %100 = arith.divf %98, %99 : vector<8x1xf32>
    %101 = vector.broadcast %93 : vector<8x1xf32> to vector<8x32xf32>
    %102 = arith.subf %87, %101 : vector<8x32xf32>
    %cst_58 = arith.constant 9.99999997E-7 : f32
    %103 = vector.broadcast %cst_58 : f32 to vector<8x1xf32>
    %104 = arith.addf %100, %103 : vector<8x1xf32>
    %105 = math.rsqrt %104 : vector<8x1xf32>
    %106 = vector.broadcast %105 : vector<8x1xf32> to vector<8x32xf32>
    %107 = arith.mulf %102, %106 : vector<8x32xf32>
    %108 = vector.broadcast %88 : vector<1x32xf32> to vector<8x32xf32>
    %109 = arith.mulf %107, %108 : vector<8x32xf32>
    %110 = vector.broadcast %89 : vector<1x32xf32> to vector<8x32xf32>
    %111 = arith.addf %109, %110 : vector<8x32xf32>
    %112 = arith.truncf %111 : vector<8x32xf32> to vector<8x32xbf16>
    %c0_59 = arith.constant 0 : index
    %c0_60 = arith.constant 0 : index
    %113 = vector.load %arg13[%c0_59, %c0_60] : memref<32x64xbf16, #tpu.memory_space<vmem>>, vector<32x64xbf16>
    %cst_61 = arith.constant dense<0.000000e+00> : vector<8x64xf32>
    %114 = tpu.matmul %112, %113, %cst_61 {dimension_numbers = #tpu.dot_dimension_numbers<[1], [0], [0], [1], [0, 0, 1, 1], [], []>} : vector<8x32xbf16>, vector<32x64xbf16>, vector<8x64xf32> -> vector<8x64xf32>
    %c0_62 = arith.constant 0 : index
    %c0_63 = arith.constant 0 : index
    %115 = vector.load %arg14[%c0_62, %c0_63] : memref<1x64xf32, #tpu.memory_space<vmem>>, vector<1x64xf32>
    %116 = vector.broadcast %115 : vector<1x64xf32> to vector<8x64xf32>
    %117 = arith.addf %114, %116 : vector<8x64xf32>
    %cst_64 = arith.constant 5.000000e-01 : f32
    %118 = vector.broadcast %cst_64 : f32 to vector<8x64xf32>
    %119 = arith.mulf %118, %117 : vector<8x64xf32>
    %cst_65 = arith.constant 0.707106769 : f32
    %120 = vector.broadcast %cst_65 : f32 to vector<8x64xf32>
    %121 = arith.mulf %117, %120 : vector<8x64xf32>
    %122 = math.erf %121 : vector<8x64xf32>
    %cst_66 = arith.constant 1.000000e+00 : f32
    %123 = vector.broadcast %cst_66 : f32 to vector<8x64xf32>
    %124 = arith.addf %123, %122 : vector<8x64xf32>
    %125 = arith.mulf %119, %124 : vector<8x64xf32>
    %126 = arith.truncf %125 : vector<8x64xf32> to vector<8x64xbf16>
    %c0_67 = arith.constant 0 : index
    %c0_68 = arith.constant 0 : index
    %127 = vector.load %arg15[%c0_67, %c0_68] : memref<64x32xbf16, #tpu.memory_space<vmem>>, vector<64x32xbf16>
    %cst_69 = arith.constant dense<0.000000e+00> : vector<8x32xf32>
    %128 = tpu.matmul %126, %127, %cst_69 {dimension_numbers = #tpu.dot_dimension_numbers<[1], [0], [0], [1], [0, 0, 1, 1], [], []>} : vector<8x64xbf16>, vector<64x32xbf16>, vector<8x32xf32> -> vector<8x32xf32>
    %c0_70 = arith.constant 0 : index
    %c0_71 = arith.constant 0 : index
    %129 = vector.load %arg16[%c0_70, %c0_71] : memref<1x32xf32, #tpu.memory_space<vmem>>, vector<1x32xf32>
    %130 = vector.broadcast %129 : vector<1x32xf32> to vector<8x32xf32>
    %131 = arith.addf %128, %130 : vector<8x32xf32>
    %132 = arith.addf %87, %131 : vector<8x32xf32>
    %c0_72 = arith.constant 0 : index
    %c0_73 = arith.constant 0 : index
    %c0_74 = arith.constant 0 : index
    %133 = vector.load %arg17[%c0_72, %c0_73, %c0_74] : memref<1x8x32xf32, #tpu.memory_space<vmem>>, vector<1x8x32xf32>
    %134 = vector.shape_cast %133 : vector<1x8x32xf32> to vector<8x32xf32>
    %135 = vector.shape_cast %132 : vector<8x32xf32> to vector<1x8x32xf32>
    tpu.vector_store %arg17[%c0_72, %c0_73, %c0_74], %135 {strides = array<i32>} : memref<1x8x32xf32, #tpu.memory_space<vmem>>, vector<1x8x32xf32>,
    return
  }
  func.func @transform_0(%arg0: i32, %arg1: i32) -> (i32, i32, i32) {
    %c0_i32 = arith.constant 0 : i32
    %c0_i32_0 = arith.constant 0 : i32
    return %arg0, %arg1, %c0_i32 : i32, i32, i32
  }
  func.func @transform_1(%arg0: i32, %arg1: i32) -> (i32, i32) {
    %c0_i32 = arith.constant 0 : i32
    %c0_i32_0 = arith.constant 0 : i32
    %c0_i32_1 = arith.constant 0 : i32
    return %c0_i32, %c0_i32_0 : i32, i32
  }
  func.func @transform_2(%arg0: i32, %arg1: i32) -> (i32, i32) {
    %c0_i32 = arith.constant 0 : i32
    %c0_i32_0 = arith.constant 0 : i32
    %c0_i32_1 = arith.constant 0 : i32
    return %c0_i32, %c0_i32_0 : i32, i32
  }
  func.func @transform_3(%arg0: i32, %arg1: i32) -> (i32, i32) {
    %c0_i32 = arith.constant 0 : i32
    %c0_i32_0 = arith.constant 0 : i32
    %c0_i32_1 = arith.constant 0 : i32
    return %c0_i32, %c0_i32_0 : i32, i32
  }
  func.func @transform_4(%arg0: i32, %arg1: i32) -> (i32, i32) {
    %c0_i32 = arith.constant 0 : i32
    %c0_i32_0 = arith.constant 0 : i32
    %c0_i32_1 = arith.constant 0 : i32
    return %c0_i32, %c0_i32_0 : i32, i32
  }
  func.func @transform_5(%arg0: i32, %arg1: i32) -> (i32, i32) {
    %c0_i32 = arith.constant 0 : i32
    %c0_i32_0 = arith.constant 0 : i32
    %c0_i32_1 = arith.constant 0 : i32
    return %c0_i32, %c0_i32_0 : i32, i32
  }
  func.func @transform_6(%arg0: i32, %arg1: i32) -> (i32, i32) {
    %c0_i32 = arith.constant 0 : i32
    %c0_i32_0 = arith.constant 0 : i32
    %c0_i32_1 = arith.constant 0 : i32
    return %c0_i32, %c0_i32_0 : i32, i32
  }
  func.func @transform_7(%arg0: i32, %arg1: i32) -> (i32, i32) {
    %c0_i32 = arith.constant 0 : i32
    %c0_i32_0 = arith.constant 0 : i32
    %c0_i32_1 = arith.constant 0 : i32
    return %c0_i32, %c0_i32_0 : i32, i32
  }
  func.func @transform_8(%arg0: i32, %arg1: i32) -> (i32, i32) {
    %c0_i32 = arith.constant 0 : i32
    %c0_i32_0 = arith.constant 0 : i32
    %c0_i32_1 = arith.constant 0 : i32
    return %c0_i32, %c0_i32_0 : i32, i32
  }
  func.func @transform_9(%arg0: i32, %arg1: i32) -> (i32, i32) {
    %c0_i32 = arith.constant 0 : i32
    %c0_i32_0 = arith.constant 0 : i32
    %c0_i32_1 = arith.constant 0 : i32
    return %c0_i32, %c0_i32_0 : i32, i32
  }
  func.func @transform_10(%arg0: i32, %arg1: i32) -> (i32, i32) {
    %c0_i32 = arith.constant 0 : i32
    %c0_i32_0 = arith.constant 0 : i32
    %c0_i32_1 = arith.constant 0 : i32
    return %c0_i32, %c0_i32_0 : i32, i32
  }
  func.func @transform_11(%arg0: i32, %arg1: i32) -> (i32, i32) {
    %c0_i32 = arith.constant 0 : i32
    %c0_i32_0 = arith.constant 0 : i32
    %c0_i32_1 = arith.constant 0 : i32
    return %c0_i32, %c0_i32_0 : i32, i32
  }
  func.func @transform_12(%arg0: i32, %arg1: i32) -> (i32, i32) {
    %c0_i32 = arith.constant 0 : i32
    %c0_i32_0 = arith.constant 0 : i32
    %c0_i32_1 = arith.constant 0 : i32
    return %c0_i32, %c0_i32_0 : i32, i32
  }
  func.func @transform_13(%arg0: i32, %arg1: i32) -> (i32, i32) {
    %c0_i32 = arith.constant 0 : i32
    %c0_i32_0 = arith.constant 0 : i32
    %c0_i32_1 = arith.constant 0 : i32
    return %c0_i32, %c0_i32_0 : i32, i32
  }
  func.func @transform_14(%arg0: i32, %arg1: i32) -> (i32, i32) {
    %c0_i32 = arith.constant 0 : i32
    %c0_i32_0 = arith.constant 0 : i32
    %c0_i32_1 = arith.constant 0 : i32
    return %c0_i32, %c0_i32_0 : i32, i32
  }
  func.func @transform_15(%arg0: i32, %arg1: i32) -> (i32, i32, i32) {
    %c0_i32 = arith.constant 0 : i32
    %c0_i32_0 = arith.constant 0 : i32
    return %arg0, %arg1, %c0_i32 : i32, i32, i32
  }
}

</mosaic_0001>

<bundles_post_ra>
// kernel: tpu_custom_call.1
= control target key start
LH: loop header
LB: loop body
LE: loop exit
PB: predicated region body
PF: predicated region fallthrough
CT: control target
= control target key end

     0   :  { %s2741_s0 = inlined_call_operand.vmem [shape: f32[2,8,32], index: 0, kind: input, shape index: {}]   ;;  %s2742_s1 = inlined_call_operand.vmem [shape: f32[1,32], index: 1, kind: input, shape index: {}]   ;;  %s2743_s2 = inlined_call_operand.vmem [shape: f32[1,32], index: 2, kind: input, shape index: {}]   ;;  %s2744_s3 = inlined_call_operand.vmem [shape: bf16[32,32], index: 3, kind: input, shape index: {}]   ;;  %s2745_s4 = inlined_call_operand.hbm [shape: f32[1,32], index: 4, kind: input, shape index: {}]   ;;  %s2746_s5 = inlined_call_operand.vmem [shape: bf16[32,64], index: 5, kind: input, shape index: {}]   ;;  %s2747_s6 = inlined_call_operand.hbm [shape: f32[1,64], index: 6, kind: input, shape index: {}]   ;;  %s2748_s7 = inlined_call_operand.hbm [shape: bf16[32,32], index: 7, kind: input, shape index: {}]   ;;  %s2749_s8 = inlined_call_operand.hbm [shape: f32[1,32], index: 8, kind: input, shape index: {}]   ;;  %s2750_s9 = inlined_call_operand.hbm [shape: f32[1,32], index: 9, kind: input, shape index: {}]   ;;  %s2751_s10 = inlined_call_operand.vmem [shape: f32[1,32], index: 10, kind: input, shape index: {}]   ;;  %s2752_s11 = inlined_call_operand.vmem [shape: bf16[32,64], index: 11, kind: input, shape index: {}]   ;;  %s2753_s12 = inlined_call_operand.vmem [shape: f32[1,64], index: 12, kind: input, shape index: {}]   ;;  %s2754_s13 = inlined_call_operand.vmem [shape: bf16[64,32], index: 13, kind: input, shape index: {}]   ;;  %s2755_s14 = inlined_call_operand.vmem [shape: f32[1,32], index: 14, kind: input, shape index: {}]   ;;  %s2756_s15 = inlined_call_operand.hbm [shape: f32[2,8,32], index: 15, kind: output, shape index: {}]  }
   0x1   :  { %2772 = sst [smem:[#allocation29_spill]] %s2745_s4 }
   0x2   :  { %2773 = sst [smem:[#allocation30_spill]] %s2747_s6 }
   0x3   :  { %2774 = sst [smem:[#allocation31_spill]] %s2755_s14 }
   0x4   :  { %2775 = sst [smem:[#allocation32_spill]] %s2756_s15 }
   0x5   :  { %20 = vsyncpa [#allocation7], 0 }
   0x6   :  { %21 = vsyncpa [#allocation10], 0 }
   0x7   :  { %22 = vsyncpa [#allocation13], 0 }
   0x8   :  { %23 = vsyncpa [#allocation8], 0 }
   0x9   :  { %25 = vsyncpa [#allocation8 + $0x1], 0  ;;  %s2338_s18 = smov 0   ;;  %s2340_s19 = smov 0  }
   0xa   :  { %s2342_s20 = smov 0   ;;  %s2344_s21 = smov 0  }
   0xb   :  { %s2346_s22 = smov 0   ;;  %s2348_s23 = smov 0  }
   0xc LB: > { %2776 = sst [smem:[#allocation20_spill]] %s2216_s18  ;;  %s1662_s24 = sadd.s32 4294967295, %s2236_s23   ;;  %s2236_s23 = sphi %s2348_s23, %s31_s23   ;;  %s2232_s22 = sphi %s2346_s22, %s2808_s22   ;;  %s2228_s21 = sphi %s2344_s21, %s2807_s21   ;;  %s2224_s20 = sphi %s2342_s20, %s2806_s20   ;;  %s2220_s19 = sphi %s2340_s19, %s2805_s19   ;;  %s2216_s18 = sphi %s2338_s18, %s2804_s18  }
   0xd   : > { %2777 = sst [smem:[#allocation21_spill]] %s2220_s19  ;;  %s1663_s25 = sadd.s32 4294967294, %s2236_s23  }
   0xe   : > { %2778 = sst [smem:[#allocation22_spill]] %s2224_s20  ;;  %s43_s26 = sadd.s32 1, %s2232_s22 }
   0xf   : > { %2779 = sst [smem:[#allocation23_spill]] %s2232_s22  ;;  %s374_s27 = sadd.s32 1, %s2224_s20 }
  0x10   : > { %2780 = sst [smem:[#allocation24_spill]] %s2236_s23  ;;  %p45_p0 = scmp.ge.s32.totalorder %s43_s26, 2 }
  0x11   : > { %p384_p1 = scmp.ne.s32.totalorder %s2224_s20, %s2220_s19  ;;  %p385_p2 = scmp.eq.s32.totalorder %s1662_s24, 1 }
  0x12   : > { %p390_p3 = scmp.ne.s32.totalorder %s2220_s19, %s2216_s18  ;;  %s2810_s26 = smov (%p45_p0, %s43_s26), 0 }
  0x13   : > { %2781 = sst [smem:[#allocation25_spill]] %s2810_s26  ;;  %p2378_p4 = por %p385_p2, %p384_p1 }
  0x14   : > { %p391_p5 = scmp.eq.s32.totalorder %s1663_s25, 1  ;;  %s369_s29 = ssub.s32 %s2232_s22, %s2810_s26 }
  0x15   : > { %s2782_s28 = scalar_select %p2378_p4, 1, 0 }
  0x16   : > { %p1664_p6 = scmp.ge.s32.totalorder %s2236_s23, 1  ;;  %p372_p7 = scmp.eq.s32.totalorder %s369_s29, 0 }
  0x17   : > { %2783 = sst [smem:[#allocation26_spill]] %s2782_s28  ;;  %p2385_p8 = por %p391_p5, %p390_p3 }
  0x18   : > { %p398_p9 = scmp.lt.s32.totalorder %s2236_s23, 3  ;;  %p2397_p11 = scmp.eq.s32.totalorder %s1662_s24, 0 }
  0x19   : > { %s2784_s30 = scalar_select %p2385_p8, 1, 0 }
  0x1a   : > { %s2391_s16 = scalar_select %p372_p7, %s2224_s20, %s374_s27  }
  0x1b   : > { %2785 = sst [smem:[#allocation27_spill]] %s2784_s30  ;;  %p2393_p10 = pnand %p1664_p6, %p398_p9 }
  0x1c   : > { %2786 = sst [smem:[#allocation28_spill]] %s2391_s16  ;;  %s2238_s25 = smov [#allocation9]  }
  0x1d   : > { %s2787_s17 = scalar_select %p2393_p10, 1, 0 }
  0x1e   : > { %s2788_s18 = scalar_select %p2397_p11, 1, 0 }
  0x1f   : > { %p1874_p12 = pneg %p2393_p10  ;;  %s434_s29 = sshll.u32 %s2238_s25, 4  ;;  %s435_s29 = int_to_ptr.vmem [resolvable:$true] %s434_s29 }
  0x20   : > { %s2239_s26 = smov [#allocation12]   ;;  %s2790_s6 = sld [smem:[#allocation30_spill]] }
  0x21   : > { %s458_s22 = sshll.u32 %s2239_s26, 4  ;;  %p2405_p13 = pnand %p2397_p11, %p1874_p12  ;;  %s2409_s22 = int_to_ptr.vmem [resolvable:$true] %s458_s22 }
  0x23   : > { %p2419_p1 = pneg %p2405_p13 }
  0x26   : > { %s2006_s20 = scalar_lea.hbm %s2790_s6, 16 }
  0x27   : > { %p2007_p0 = scmp.ne.s32.totalorder %s2790_s6, %s2006_s20  ;;  %p2013_p5 = scmp.lt.u32.totalorder %s2006_s20, %s2790_s6 }
  0x29   : > { %p2009_p2 = pnand %p2419_p1, %p2007_p0 }
  0x2b   : > { %p2010_p3 = pneg %p2009_p2 }
  0x2d   : > { %p2015_p6 = pnand %p2013_p5, %p2010_p3 }
  0x2f   : > { %2018 = shalt.err (!%p2015_p6)
}
  0x30   : > { %s2019_s16 = scalar_lea.vmem %s435_s29, 16  ;;  %s2026_s23 = scalar_lea.vmem %s435_s29, 32 }
  0x31   : > { %p2020_p7 = scmp.ne.s32.totalorder %s435_s29, %s2019_s16  ;;  %p2027_p8 = scmp.lt.s32.totalorder %s435_s29, %s435_s29 }
  0x32   : > { %p2028_p4 = scmp.lt.s32.totalorder %s2026_s23, %s2019_s16 }
  0x33   : > { %p2022_p9 = pnand %p2020_p7, %p2419_p1 }
  0x34   : > { %p2029_p11 = por %p2028_p4, %p2027_p8 }
  0x35   : > { %p2023_p12 = pneg %p2022_p9 }
  0x37   : > { %p2030_p10 = pnand %p2029_p11, %p2023_p12 }
  0x39   : > { %2033 = shalt.err (!%p2030_p10)
}
  0x3a   : > { %1880 = dma.hbm_to_vmem [thread:$0]  (!%p2405_p13), %s2790_s6, 16, %s435_s29, [#allocation10]  }
  0x3b   : > { %s2034_s26 = scalar_lea.hbm %s2749_s8, 16 }
  0x3c   : > { %p2035_p0 = scmp.ne.s32.totalorder %s2749_s8, %s2034_s26  ;;  %p2041_p8 = scmp.lt.u32.totalorder %s2034_s26, %s2749_s8 }
  0x3e   : > { %p2037_p2 = pnand %p2035_p0, %p2419_p1 }
  0x40   : > { %p2038_p4 = pneg %p2037_p2 }
  0x42   : > { %p2043_p10 = pnand %p2041_p8, %p2038_p4 }
  0x44   : > { %2046 = shalt.err (!%p2043_p10)
}
  0x45   : > { %s2047_s29 = scalar_lea.vmem %s2409_s22, 16  ;;  %s2054_s14 = scalar_lea.vmem %s2409_s22, 32 }
  0x46   : > { %p2048_p11 = scmp.ne.s32.totalorder %s2409_s22, %s2047_s29  ;;  %p2055_p6 = scmp.lt.s32.totalorder %s2409_s22, %s2409_s22 }
  0x47   : > { %p2056_p7 = scmp.lt.s32.totalorder %s2054_s14, %s2047_s29 }
  0x48   : > { %p2050_p3 = pnand %p2048_p11, %p2419_p1 }
  0x49   : > { %p2057_p9 = por %p2056_p7, %p2055_p6 }
  0x4a   : > { %p2051_p5 = pneg %p2050_p3 }
  0x4c   : > { %p2058_p12 = pnand %p2057_p9, %p2051_p5 }
  0x4e   : > { %2061 = shalt.err (!%p2058_p12)
}
  0x4f   : > { %1886 = dma.hbm_to_vmem [thread:$0]  (!%p2405_p13), %s2749_s8, 16, %s2409_s22, [#allocation13]  }
  0x50   : > { %s2240_s24 = smov [#allocation6]   ;;  %s2241_s20 = smov [#allocation11]  }
  0x51   : > { %s420_s15 = sshll.u32 %s2240_s24, 4  ;;  %s444_s26 = sshll.u32 %s2241_s20, 4  ;;  %s421_s15 = int_to_ptr.vmem [resolvable:$true] %s420_s15  ;;  %s445_s26 = int_to_ptr.vmem [resolvable:$true] %s444_s26 }
  0x52   : > { %s2792_s4 = sld [smem:[#allocation29_spill]] }
  0x58   : > { %s2062_s29 = scalar_lea.hbm %s2792_s4, 16 }
  0x59   : > { %p2063_p0 = scmp.ne.s32.totalorder %s2792_s4, %s2062_s29  ;;  %p2069_p8 = scmp.lt.u32.totalorder %s2062_s29, %s2792_s4 }
  0x5b   : > { %p2065_p2 = pnand %p2063_p0, %p2419_p1 }
  0x5d   : > { %p2066_p4 = pneg %p2065_p2 }
  0x5f   : > { %p2071_p10 = pnand %p2069_p8, %p2066_p4 }
  0x61   : > { %2074 = shalt.err (!%p2071_p10)
}
  0x62   : > { %s2075_s22 = scalar_lea.vmem %s421_s15, 16  ;;  %s2082_s30 = scalar_lea.vmem %s421_s15, 32 }
  0x63   : > { %p2076_p11 = scmp.ne.s32.totalorder %s421_s15, %s2075_s22  ;;  %p2083_p6 = scmp.lt.s32.totalorder %s421_s15, %s421_s15 }
  0x64   : > { %p2084_p7 = scmp.lt.s32.totalorder %s2082_s30, %s2075_s22 }
  0x65   : > { %p2078_p3 = pnand %p2076_p11, %p2419_p1 }
  0x66   : > { %p2085_p9 = por %p2084_p7, %p2083_p6 }
  0x67   : > { %p2079_p5 = pneg %p2078_p3 }
  0x69   : > { %p2086_p12 = pnand %p2085_p9, %p2079_p5 }
  0x6b   : > { %2089 = shalt.err (!%p2086_p12)
}
  0x6c   : > { %1877 = dma.hbm_to_vmem [thread:$0]  (!%p2405_p13), %s2792_s4, 16, %s421_s15, [#allocation7]  }
  0x6d   : > { %s2090_s16 = scalar_lea.hbm %s2748_s7, 256 }
  0x6e   : > { %p2091_p0 = scmp.ne.s32.totalorder %s2748_s7, %s2090_s16  ;;  %p2097_p8 = scmp.lt.u32.totalorder %s2090_s16, %s2748_s7 }
  0x70   : > { %p2093_p2 = pnand %p2091_p0, %p2419_p1 }
  0x72   : > { %p2094_p4 = pneg %p2093_p2 }
  0x74   : > { %p2099_p10 = pnand %p2097_p8, %p2094_p4 }
  0x76   : > { %2102 = shalt.err (!%p2099_p10)
}
  0x77   : > { %s2103_s22 = scalar_lea.vmem %s445_s26, 256  ;;  %p2111_p6 = scmp.lt.s32.totalorder %s445_s26, %s445_s26 }
  0x78   : > { %p2104_p11 = scmp.ne.s32.totalorder %s445_s26, %s2103_s22  ;;  %p2112_p7 = scmp.lt.s32.totalorder %s2103_s22, %s2103_s22 }
  0x7a   : > { %p2106_p3 = pnand %p2104_p11, %p2419_p1  ;;  %p2113_p9 = por %p2112_p7, %p2111_p6 }
  0x7c   : > { %p2107_p5 = pneg %p2106_p3 }
  0x7e   : > { %p2114_p12 = pnand %p2113_p9, %p2107_p5 }
  0x80   : > { %2117 = shalt.err (!%p2114_p12)
}
  0x81   : > { %s2242_s15 = smov 64   ;;  %s2243_s30 = smov 4  }
  0x82   : > { %1883 = dma.hbm_to_vmem [thread:$0]  (!%p2405_p13), %s2748_s7, 256, %s445_s26, [#allocation10], %s2242_s15, %s2242_s15, %s2243_s30  }
  0x83   : > { %s2244_s19 = smov [#allocation14]   ;;  %s2118_s29 = scalar_lea.hbm %s2750_s9, 16 }
  0x84   : > { %s469_s20 = sshll.u32 %s2244_s19, 4  ;;  %p2119_p0 = scmp.ne.s32.totalorder %s2750_s9, %s2118_s29  ;;  %s470_s20 = int_to_ptr.vmem [resolvable:$true] %s469_s20 }
  0x85   : > { %p2125_p8 = scmp.lt.u32.totalorder %s2118_s29, %s2750_s9 }
  0x86   : > { %p2121_p2 = pnand %p2119_p0, %p2419_p1 }
  0x88   : > { %p2122_p4 = pneg %p2121_p2 }
  0x8a   : > { %p2127_p10 = pnand %p2125_p8, %p2122_p4 }
  0x8c   : > { %2130 = shalt.err (!%p2127_p10)
}
  0x8d   : > { %s2131_s26 = scalar_lea.vmem %s470_s20, 16  ;;  %s2138_s15 = scalar_lea.vmem %s470_s20, 32 }
  0x8e   : > { %p2132_p11 = scmp.ne.s32.totalorder %s470_s20, %s2131_s26  ;;  %p2139_p6 = scmp.lt.s32.totalorder %s470_s20, %s470_s20 }
  0x8f   : > { %p2140_p7 = scmp.lt.s32.totalorder %s2138_s15, %s2131_s26 }
  0x90   : > { %p2134_p3 = pnand %p2132_p11, %p2419_p1 }
  0x91   : > { %p2141_p9 = por %p2140_p7, %p2139_p6 }
  0x92   : > { %p2135_p5 = pneg %p2134_p3 }
  0x94   : > { %p2142_p12 = pnand %p2141_p9, %p2135_p5 }
  0x96   : > { %2145 = shalt.err (!%p2142_p12)
}
  0x97   : > { %1889 = dma.hbm_to_vmem [thread:$0]  (!%p2405_p13), %s2750_s9, 16, %s470_s20, [#allocation13]  }
  0x98   : > { %p2793_p0 = scmp.ne.s32.totalorder %s2787_s17, 0 }
  0x99   : > { %p2794_p2 = scmp.ne.s32.totalorder (!%p2793_p0), %s2788_s18, 0 }
  0x9a   : > { %507 = sbr.rel (%p2793_p0) target bundleno = 2704 (0xa90), region = 80 }
  0xa1   : > { %2199 = dma.done.wait (%p2794_p2), [#allocation7], 16  }
  0xa2   : > { %2201 = vsyncadd (%p2794_p2), [#allocation7], 4294967280 }
  0xa3   : > { %2203 = dma.done.wait (%p2794_p2), [#allocation10], 272  }
  0xa4   : > { %2205 = vsyncadd (%p2794_p2), [#allocation10], 4294967024 }
  0xa5   : > { %2207 = dma.done.wait (%p2794_p2), [#allocation13], 32  }
  0xa6   : > { %2209 = vsyncadd (%p2794_p2), [#allocation13], 4294967264  ;;  %p573_p13 = scmp.lt.s32.totalorder %s2228_s21, 1  ;;  %vm584_vm0 = vcmask 261120   ;;  %v1972_v7 = vld [vmem:[%s2746_s5] sm:$0xff]   ;;  %v2245_v8 = vmov 0.0  }
  0xa7   : > { %1760 = vmatprep.subr.bf16.mxu1 %v2245_v8  ;;  %vm2246_vm1 = vmmov 0   ;;  %v1973_v9 = vld [vmem:[%s2746_s5 + $0x8] sm:$0xff]   ;;  %1776 = vmatprep.subr.bf16.mxu0 %v2245_v8  ;;  %v1679_v14 = vld [vmem:[%s2742_s1] ss:$0 sm:$0xff]  ;;  %v1681_v22 = vld [vmem:[#allocation9] ss:$0 sm:$0xff] }
  0xa8   : > { %s574_s4 = scalar_select %p573_p13, %s2228_s21, 1  ;;  %1764 = vmatprep.mubr.msk.bf16.mxu1 %vm2246_vm1, %v2245_v8  ;;  %1761 = vmatpush3.bf16.msra.mxu1 %v1972_v7  ;;  %v1680_v16 = vld [vmem:[%s2743_s2] ss:$0 sm:$0xff]  ;;  %v1975_v21 = vld [vmem:[%s2744_s3 + $0x8] sm:$0xff]   ;;  %vm685_vm2 = vcmask 60416   ;;  %vm824_vm3 = vcmask 64512  }
  0xa9   : > { %1762 = vmatprep.subr.bf16.mxu1 %v2245_v8  ;;  %1778 = vmatprep.mubr.msk.bf16.mxu0 %vm2246_vm1, %v2245_v8  ;;  %v1974_v19 = vld [vmem:[%s2744_s3] sm:$0xff]   ;;  %s2247_s6 = smov 104   ;;  %v1686_v29 = vld [vmem:[#allocation6] ss:$0 sm:$0xff]  ;;  %s2250_s27 = smov 96   ;;  %vm1060_vm4 = vcmask 1043456  }
  0xaa   : > { %s1678_s17 = sshll.u32 %s574_s4, 3  ;;  %s2248_s4 = smov 120   ;;  %vm1253_vm5 = vcmask 126016   ;;  %vm1261_vm6 = vcmask 191616   ;;  %vm1269_vm7 = vcmask 257216   ;;  %vm1480_vm8 = vcmask 523264  }
  0xab   : > { %s579_s24 = scalar_lea.vmem %s2741_s0, %s1678_s17  ;;  %s2249_s17 = smov 112  }
  0xac   : > { %v2532_v0 = vld [vmem:[%s579_s24] sm:$0xff]  ;;  %1763 = vmatpush3.bf16.msra.mxu1 %v1973_v9  ;;  %s2251_s25 = smov 88   ;;  %s2252_s24 = smov 80  }
  0xad   : > { %v585_v1 = vsel %vm584_vm0, %v2532_v0, 0.0  ;;  %1768 = vmatprep.subr.bf16.mxu1 %v2245_v8  ;;  %s2253_s18 = smov 72   ;;  %s2254_s19 = smov 8  }
  0xae   : > { %586 = vadd.xlane.f32.xlu0 %v585_v1  ;;  %s2255_s20 = smov 24   ;;  %s2256_s16 = smov 16  }
  0xaf   : > { %s2796_s28 = sld [smem:[#allocation31_spill]]  ;;  %s2797_s22 = sld [smem:[#allocation26_spill]] }
  0xb0   : > { %s1719_s26 = sshll.u32 %s2228_s21, 7 }
  0xb5   : > { %p2799_p4 = scmp.ne.s32.totalorder %s2797_s22, 0 }
 0x13b   : > { %v587_v2 = vpop.xlane.xlu0 %586 }
 0x13c   : > { %v589_v3 = vmul.f32 0.03125, %v587_v2 }
 0x13e   : > { %v590_v4 = vsub.f32 %v2532_v0, %v589_v3 }
 0x140   : > { %v591_v5 = vmul.f32 %v590_v4, %v590_v4 }
 0x142   : > { %v592_v6 = vsel %vm584_vm0, %v591_v5, 0.0 }
 0x143   : > { %593 = vadd.xlane.f32.xlu0 %v592_v6 }
 0x1d0   : > { %v594_v10 = vpop.xlane.xlu0 %593 }
 0x1d1   : > { %v595_v11 = vmul.f32 0.03125, %v594_v10 }
 0x1d3   : > { %v596_v12 = vadd.f32 1e-06, %v595_v11 }
 0x1d5   : > { %1984 = vrsqrt.f32 %v596_v12 }
 0x1df   : > { %v1985_v13 = vpop.eup %1984 }
 0x1e0   : > { %v598_v15 = vmul.f32 %v1985_v13, %v590_v4 }
 0x1e2   : > { %v605_v17 = vmul.f32 %v1679_v14, %v598_v15 }
 0x1e4   : > { %v612_v18 = vadd.f32 %v1680_v16, %v605_v17 }
 0x1e6   : > { %v617_v20 = vpack.c.bf16 %v612_v18, %v612_v18 }
 0x1e8   : > { %1765 = vmatmul.mubr.msk.bf16.vlgmr.msra.gmra.mrb[0].mxu1 %vm584_vm0, %v617_v20 }
 0x1e9   : > { %1769 = vmatpush3.bf16.msra.mxu1 %v1974_v19  ;;  %1772 = vmatprep.mubr.msk.bf16.mxu1 %vm2246_vm1, %v2245_v8 }
 0x1ea   : > { %1770 = vmatprep.subr.bf16.mxu1 %v2245_v8 }
 0x1ed   : > { %1771 = vmatpush3.bf16.msra.mxu1 %v1975_v21 }
 0x1ee   : > { %1782 = vmatprep.subr.bf16.mxu1 %v2245_v8 }
 0x1f0   : > { %1773 = vmatmul.mubr.msk.bf16.vlgmr.msra.gmra.mrb[4].mxu1 %vm584_vm0, %v617_v20 }
 0x1f1   : > { %1784 = vmatprep.mubr.msk.bf16.mxu1 %vm2246_vm1, %v2245_v8 }
 0x2bb   : > { %v678_v23 = vpop.f32.mrb[0].mxu1 }
 0x2bc   : > { %v679_v24 = vadd.f32 %v1681_v22, %v678_v23  ;;  %v1766_v25 = vpop.f32.mrb[1].mxu1 }
 0x2bd   : > { %v681_v26 = vpop.f32.mrb[2].mxu1 }
 0x2be   : > { %v2572_v27 = vpack.c.bf16 %v679_v24, %v679_v24  ;;  %v1767_v28 = vpop.f32.mrb[3].mxu1 }
 0x2c0   : > { %686 = vst.msk [vmem:[#allocation2] sm:$0xf] %vm685_vm2, %v2572_v27  ;;  %714 = vrot.lane.b32.xlu0 %v2572_v27, %s2247_s6  ;;  %694 = vrot.lane.b32.xlu1 %v2572_v27, %s2248_s4 }
 0x2c3   : > { %v785_v30 = vpop.f32.mrb[4].mxu1 }
 0x2c4   : > { %v786_v31 = vadd.f32 %v1686_v29, %v785_v30  ;;  %704 = vrot.lane.b32.xlu1 %v2572_v27, %s2249_s17  ;;  %v1774_v32 = vpop.f32.mrb[5].mxu1 }
 0x2c5   : > { %v788_v33 = vpop.f32.mrb[6].mxu1 }
 0x2c6   : > { %v791_v34 = vpack.c.bf16 %v786_v31, %v786_v31  ;;  %v1775_v35 = vpop.f32.mrb[7].mxu1 }
 0x2c7   : > { %v816_v36 = vld [vmem:[#allocation2] sm:$0xf] }
 0x2c8   : > { %793 = vst.msk [vmem:[#allocation4] sm:$0xf] %vm685_vm2, %v791_v34  ;;  %797 = vrot.lane.b32.xlu1 %v791_v34, %s2248_s4  ;;  %v829_v37 = vsel %vm824_vm3, %v816_v36, 0 }
 0x2c9   : > { %1777 = vmatpush3.bf16.xpose.msra.mxu0 %v829_v37 }
 0x2ca   : > { %1788 = vmatprep.subr.bf16.mxu0 %v2245_v8 }
 0x2cc   : > { %802 = vrot.lane.b32.xlu1 %v791_v34, %s2249_s17  ;;  %s2798_s17 = sld [smem:[#allocation32_spill]] }
 0x2cf   : > { %v812_v38 = vld [vmem:[#allocation4] sm:$0xf] }
 0x2d0   : > { %807 = vrot.lane.b32.xlu1 %v791_v34, %s2247_s6  ;;  %1779 = vmatmul.mubr.msk.bf16.vlgmr.msra.gmra.mrb[0].mxu0 %vm824_vm3, %v812_v38 }
 0x2d1   : > { %1790 = vmatprep.mubr.msk.bf16.mxu0 %vm2246_vm1, %v2245_v8 }
 0x332   : > { %v715_v39 = vpop.permute.xlu0 %714  ;;  %v695_v40 = vpop.permute.xlu1 %694 }
 0x333   : > { %718 = vst.msk [vmem:[#allocation2 + $0xc] sm:$0xf] %vm685_vm2, %v715_v39  ;;  %698 = vst.msk [vmem:[#allocation2 + $0x4] sm:$0xf] %vm685_vm2, %v695_v40 }
 0x336   : > { %v705_v41 = vpop.permute.xlu1 %704 }
 0x337   : > { %708 = vst.msk [vmem:[#allocation2 + $0x8] sm:$0xf] %vm685_vm2, %v705_v41 }
 0x33a   : > { %v798_v42 = vpop.permute.xlu1 %797  ;;  %v817_v43 = vld [vmem:[#allocation2 + $0x4] sm:$0xf]  ;;  %v819_v48 = vld [vmem:[#allocation2 + $0xc] sm:$0xf] }
 0x33b   : > { %801 = vst.msk [vmem:[#allocation4 + $0x4] sm:$0xf] %vm685_vm2, %v798_v42  ;;  %v875_v44 = vsel %vm824_vm3, %v817_v43, 0  ;;  %v967_v51 = vsel %vm824_vm3, %v819_v48, 0 }
 0x33c   : > { %1783 = vmatpush3.bf16.xpose.msra.mxu1 %v875_v44 }
 0x33d   : > { %1794 = vmatprep.subr.bf16.mxu1 %v2245_v8 }
 0x33e   : > { %v803_v45 = vpop.permute.xlu1 %802  ;;  %v818_v46 = vld [vmem:[#allocation2 + $0x8] sm:$0xf] }
 0x33f   : > { %806 = vst.msk [vmem:[#allocation4 + $0x8] sm:$0xf] %vm685_vm2, %v803_v45  ;;  %v921_v47 = vsel %vm824_vm3, %v818_v46, 0 }
 0x340   : > { %1789 = vmatpush3.bf16.xpose.msra.mxu0 %v921_v47 }
 0x341   : > { %1800 = vmatprep.subr.bf16.mxu0 %v2245_v8 }
 0x342   : > { %v808_v49 = vpop.permute.xlu1 %807  ;;  %v813_v50 = vld [vmem:[#allocation4 + $0x4] sm:$0xf] }
 0x343   : > { %811 = vst.msk [vmem:[#allocation4 + $0xc] sm:$0xf] %vm685_vm2, %v808_v49  ;;  %1785 = vmatmul.mubr.msk.bf16.vlgmr.msra.gmra.mrb[8].mxu1 %vm824_vm3, %v813_v50 }
 0x344   : > { %1795 = vmatpush3.bf16.xpose.msra.mxu1 %v967_v51  ;;  %1796 = vmatprep.mubr.msk.bf16.mxu1 %vm2246_vm1, %v2245_v8 }
 0x345   : > { %1806 = vmatprep.subr.bf16.mxu1 %v2245_v8 }
 0x346   : > { %v814_v52 = vld [vmem:[#allocation4 + $0x8] sm:$0xf] }
 0x347   : > { %1791 = vmatmul.mubr.msk.bf16.vlgmr.msra.gmra.mrb[4].mxu0 %vm824_vm3, %v814_v52 }
 0x348   : > { %1802 = vmatprep.mubr.msk.bf16.mxu0 %vm2246_vm1, %v2245_v8 }
 0x34a   : > { %v815_v53 = vld [vmem:[#allocation4 + $0xc] sm:$0xf] }
 0x34b   : > { %1797 = vmatmul.mubr.msk.bf16.vlgmr.msra.gmra.mrb[12].mxu1 %vm824_vm3, %v815_v53 }
 0x34c   : > { %1808 = vmatprep.mubr.msk.bf16.mxu1 %vm2246_vm1, %v2245_v8 }
 0x3a3   : > { %v865_v54 = vpop.f32.mrb[0].mxu0 }
 0x3a4   : > { %v1780_v55 = vpop.f32.mrb[1].mxu0  ;;  %v1009_v56 = vsel %vm824_vm3, %v865_v54, -inf }
 0x3a5   : > { %1010 = vmax.xlane.f32.xlu1 %v1009_v56  ;;  %v868_v57 = vpop.f32.mrb[2].mxu0 }
 0x3a6   : > { %v1781_v58 = vpop.f32.mrb[3].mxu0 }
 0x416   : > { %v911_v59 = vpop.f32.mrb[8].mxu1 }
 0x417   : > { %v1786_v60 = vpop.f32.mrb[9].mxu1  ;;  %v1012_v61 = vsel %vm824_vm3, %v911_v59, -inf }
 0x418   : > { %1013 = vmax.xlane.f32.xlu0 %v1012_v61  ;;  %v914_v62 = vpop.f32.mrb[10].mxu1 }
 0x419   : > { %v1787_v63 = vpop.f32.mrb[11].mxu1 }
 0x41a   : > { %v957_v1 = vpop.f32.mrb[4].mxu0 }
 0x41b   : > { %v1792_v2 = vpop.f32.mrb[5].mxu0  ;;  %v1015_v3 = vsel %vm824_vm3, %v957_v1, -inf }
 0x41c   : > { %1016 = vmax.xlane.f32.xlu1 %v1015_v3  ;;  %v960_v4 = vpop.f32.mrb[6].mxu0  ;;  %v1976_v2 = vld [vmem:[#allocation11] sm:$0xff]  }
 0x41d   : > { %v1793_v5 = vpop.f32.mrb[7].mxu0 }
 0x41e   : > { %v1003_v6 = vpop.f32.mrb[12].mxu1 }
 0x41f   : > { %v1798_v7 = vpop.f32.mrb[13].mxu1  ;;  %v1018_v9 = vsel %vm824_vm3, %v1003_v6, -inf }
 0x420   : > { %1019 = vmax.xlane.f32.xlu1 %v1018_v9  ;;  %v1006_v10 = vpop.f32.mrb[14].mxu1 }
 0x421   : > { %v1799_v11 = vpop.f32.mrb[15].mxu1 }
 0x42e   : > { %690 = vrot.lane.b32.xlu0 %v2572_v27, %s2250_s27  ;;  %s2693_s27 = scalar_lea.hbm %s2798_s17, %s1719_s26 }
 0x431   : > { %699 = vrot.lane.b32.xlu1 %v2572_v27, %s2251_s25 }
 0x432   : > { %v1011_v12 = vpop.xlane.xlu1 %1010 }
 0x433   : > { %v1021_v13 = vsub.f32 %v865_v54, %v1011_v12 }
 0x435   : > { %v1025_v14 = vmul.f32 1.442695, %v1021_v13 }
 0x437   : > { %1986 = vpow2.f32 %v1025_v14 }
 0x441   : > { %v1987_v15 = vpop.eup %1986 }
 0x442   : > { %v1033_v16 = vsel %vm824_vm3, %v1987_v15, 0.0 }
 0x44d   : > { %1034 = vadd.xlane.f32.xlu0 %v1033_v16 }
 0x4a5   : > { %v1014_v17 = vpop.xlane.xlu0 %1013 }
 0x4a6   : > { %v1022_v18 = vsub.f32 %v911_v59, %v1014_v17 }
 0x4a8   : > { %v1027_v19 = vmul.f32 1.442695, %v1022_v18 }
 0x4a9   : > { %v1017_v20 = vpop.xlane.xlu1 %1016  ;;  %v691_v21 = vpop.permute.xlu0 %690 }
 0x4aa   : > { %1988 = vpow2.f32 %v1027_v19  ;;  %v1023_v22 = vsub.f32 %v957_v1, %v1017_v20  ;;  %693 = vst.msk [vmem:[#allocation3] sm:$0xf] %vm685_vm2, %v691_v21 }
 0x4ac   : > { %v1029_v23 = vmul.f32 1.442695, %v1023_v22 }
 0x4ad   : > { %v1020_v24 = vpop.xlane.xlu1 %1019 }
 0x4ae   : > { %1990 = vpow2.f32 %v1029_v23  ;;  %v1024_v25 = vsub.f32 %v1003_v6, %v1020_v24  ;;  %v1977_v6 = vld [vmem:[#allocation11 + $0x8] sm:$0xff]   ;;  %v1702_v24 = vld [vmem:[#allocation12] ss:$0 sm:$0xff] }
 0x4b0   : > { %v1031_v26 = vmul.f32 1.442695, %v1024_v25 }
 0x4b1   : > { %v700_v28 = vpop.permute.xlu1 %699  ;;  %v820_v29 = vld [vmem:[#allocation3] sm:$0xf] }
 0x4b2   : > { %1992 = vpow2.f32 %v1031_v26  ;;  %703 = vst.msk [vmem:[#allocation3 + $0x4] sm:$0xf] %vm685_vm2, %v700_v28  ;;  %v1062_v30 = vsel %vm1060_vm4, %v820_v29, 0 }
 0x4b3   : > { %1801 = vmatpush3.bf16.msra.mxu0 %v1062_v30 }
 0x4b4   : > { %v1989_v31 = vpop.eup %1988  ;;  %1812 = vmatprep.subr.bf16.mxu0 %v2245_v8 }
 0x4b5   : > { %v1036_v32 = vsel %vm824_vm3, %v1989_v31, 0.0 }
 0x4b6   : > { %1037 = vadd.xlane.f32.xlu1 %v1036_v32 }
 0x4b8   : > { %v1991_v33 = vpop.eup %1990 }
 0x4b9   : > { %v1039_v34 = vsel %vm824_vm3, %v1991_v33, 0.0  ;;  %v821_v35 = vld [vmem:[#allocation3 + $0x4] sm:$0xf] }
 0x4ba   : > { %1040 = vadd.xlane.f32.xlu0 %v1039_v34  ;;  %v1108_v36 = vsel %vm1060_vm4, %v821_v35, 0 }
 0x4bb   : > { %1807 = vmatpush3.bf16.msra.mxu1 %v1108_v36 }
 0x4bc   : > { %v1993_v37 = vpop.eup %1992  ;;  %1818 = vmatprep.subr.bf16.mxu1 %v2245_v8 }
 0x4bd   : > { %v1042_v38 = vsel %vm824_vm3, %v1993_v37, 0.0 }
 0x4be   : > { %1043 = vadd.xlane.f32.xlu1 %v1042_v38  ;;  %v1978_v38 = vld [vmem:[%s2752_s11] sm:$0xff]  }
 0x4cf   : > { %709 = vrot.lane.b32.xlu1 %v2572_v27, %s2252_s24  ;;  %s2257_s24 = smov [#allocation15]  }
 0x4d0   : > { %719 = vrot.lane.b32.xlu0 %v2572_v27, %s2253_s18  ;;  %s2150_s18 = sshll.u32 %s2257_s24, 4  ;;  %s2151_s18 = int_to_ptr.vmem [resolvable:$false] %s2150_s18 }
 0x4da   : > { %v1035_v39 = vpop.xlane.xlu0 %1034 }
 0x4db   : > { %1994 = vrcp.f32 %v1035_v39 }
 0x4e5   : > { %v1995_v40 = vpop.eup %1994 }
 0x4e6   : > { %v1049_v41 = vmul.f32 %v1995_v40, %v1987_v15 }
 0x4e8   : > { %v1053_v42 = vpack.c.bf16 %v1049_v41, %v1049_v41 }
 0x4ea   : > { %1803 = vmatmul.mubr.msk.bf16.vlgmr.msra.gmra.mrb[8].mxu0 %vm824_vm3, %v1053_v42 }
 0x4eb   : > { %1814 = vmatprep.mubr.msk.bf16.mxu0 %vm2246_vm1, %v2245_v8 }
 0x543   : > { %v1038_v43 = vpop.xlane.xlu1 %1037 }
 0x544   : > { %1996 = vrcp.f32 %v1038_v43  ;;  %v1706_v43 = vld [vmem:[#allocation14] ss:$0 sm:$0xff] }
 0x547   : > { %v1041_v44 = vpop.xlane.xlu0 %1040 }
 0x548   : > { %1998 = vrcp.f32 %v1041_v44 }
 0x54b   : > { %v720_v45 = vpop.permute.xlu0 %719  ;;  %v1044_v46 = vpop.xlane.xlu1 %1043 }
 0x54c   : > { %723 = vst.msk [vmem:[#allocation3 + $0xc] sm:$0xf] %vm685_vm2, %v720_v45  ;;  %2000 = vrcp.f32 %v1044_v46  ;;  %v1707_v45 = vld [vmem:[%s2751_s10] ss:$0 sm:$0xff] }
 0x54e   : > { %v1997_v27 = vpop.eup %1996 }
 0x54f   : > { %v1050_v47 = vmul.f32 %v1997_v27, %v1989_v31  ;;  %v710_v48 = vpop.permute.xlu1 %709 }
 0x550   : > { %713 = vst.msk [vmem:[#allocation3 + $0x8] sm:$0xf] %vm685_vm2, %v710_v48  ;;  %v1980_v48 = vld [vmem:[%s2754_s13] sm:$0xff]  }
 0x551   : > { %v1054_v49 = vpack.c.bf16 %v1050_v47, %v1050_v47 }
 0x552   : > { %v1999_v50 = vpop.eup %1998 }
 0x553   : > { %1809 = vmatmul.mubr.msk.bf16.vlgmr.msra.gmra.mrb[16].mxu1 %vm824_vm3, %v1054_v49  ;;  %v823_v51 = vld [vmem:[#allocation3 + $0xc] sm:$0xf]  ;;  %v1051_v54 = vmul.f32 %v1999_v50, %v1991_v33  ;;  %v1981_v49 = vld [vmem:[%s2754_s13 + $0x8] sm:$0xff]   ;;  %v1982_v50 = vld [vmem:[%s2754_s13 + $0x10] sm:$0xff]  }
 0x554   : > { %v1200_v52 = vsel %vm1060_vm4, %v823_v51, 0  ;;  %1820 = vmatprep.mubr.msk.bf16.mxu1 %vm2246_vm1, %v2245_v8  ;;  %v1983_v51 = vld [vmem:[%s2754_s13 + $0x18] sm:$0xff]  }
 0x555   : > { %1819 = vmatpush3.bf16.msra.mxu1 %v1200_v52  ;;  %v1055_v59 = vpack.c.bf16 %v1051_v54, %v1051_v54  ;;  %v1708_v52 = vld [vmem:[%s2753_s12] ss:$0 sm:$0xff] }
 0x556   : > { %v2001_v53 = vpop.eup %2000  ;;  %1832 = vmatprep.subr.bf16.mxu1 %v2245_v8 }
 0x557   : > { %v1052_v55 = vmul.f32 %v2001_v53, %v1993_v37  ;;  %v822_v56 = vld [vmem:[#allocation3 + $0x8] sm:$0xf] }
 0x558   : > { %v1154_v57 = vsel %vm1060_vm4, %v822_v56, 0 }
 0x559   : > { %1813 = vmatpush3.bf16.msra.mxu0 %v1154_v57  ;;  %v1056_v58 = vpack.c.bf16 %v1052_v55, %v1052_v55 }
 0x55a   : > { %1824 = vmatprep.subr.bf16.mxu0 %v2245_v8 }
 0x55b   : > { %1821 = vmatmul.mubr.msk.bf16.vlgmr.msra.gmra.mrb[20].mxu1 %vm824_vm3, %v1056_v58 }
 0x55c   : > { %1815 = vmatmul.mubr.msk.bf16.vlgmr.msra.gmra.mrb[12].mxu0 %vm824_vm3, %v1055_v59  ;;  %1836 = vmatprep.mubr.msk.bf16.mxu1 %vm2246_vm1, %v2245_v8 }
 0x55d   : > { %1828 = vmatprep.mubr.msk.bf16.mxu0 %vm2246_vm1, %v2245_v8  ;;  %1825 = vmatpush3.bf16.msra.mxu0 %v1976_v2 }
 0x55e   : > { %1826 = vmatprep.subr.bf16.mxu0 %v2245_v8  ;;  %1833 = vmatpush3.bf16.msra.mxu1 %v1978_v38 }
 0x55f   : > { %1834 = vmatprep.subr.bf16.mxu1 %v2245_v8 }
 0x561   : > { %1827 = vmatpush3.bf16.msra.mxu0 %v1977_v6 }
 0x562   : > { %1840 = vmatprep.subr.bf16.mxu0 %v2245_v8 }
 0x5bd   : > { %v1098_v60 = vpop.f32.mrb[8].mxu0 }
 0x5be   : > { %v1242_v61 = vpack.c.bf16 %v1098_v60, %v1098_v60  ;;  %v1804_v62 = vpop.f32.mrb[9].mxu0 }
 0x5bf   : > { %v1101_v63 = vpop.f32.mrb[10].mxu0 }
 0x5c0   : > { %1246 = vst.msk [vmem:[#allocation5] sm:$0xf] %vm685_vm2, %v1242_v61  ;;  %v1805_v1 = vpop.f32.mrb[11].mxu0  ;;  %v1712_v63 = vld [vmem:[%s2796_s28] ss:$0 sm:$0xff] }
 0x626   : > { %v1144_v3 = vpop.f32.mrb[16].mxu1 }
 0x627   : > { %v1724_v4 = vpack.c.bf16 %v1144_v3, %v1144_v3  ;;  %v1810_v5 = vpop.f32.mrb[17].mxu1 }
 0x628   : > { %v1147_v7 = vpop.f32.mrb[18].mxu1 }
 0x629   : > { %1250 = vrot.lane.b32.xlu1 %v1724_v4, %s2254_s19  ;;  %v1811_v9 = vpop.f32.mrb[19].mxu1  ;;  %s2152_s19 = scalar_lea.vmem %s2151_s18, 256 }
 0x62e   : > { %v1236_v10 = vpop.f32.mrb[20].mxu1 }
 0x62f   : > { %v1726_v11 = vpack.c.bf16 %v1236_v10, %v1236_v10  ;;  %v1190_v12 = vpop.f32.mrb[12].mxu0  ;;  %v1822_v13 = vpop.f32.mrb[21].mxu1 }
 0x630   : > { %v1725_v14 = vpack.c.bf16 %v1190_v12, %v1190_v12  ;;  %v1816_v15 = vpop.f32.mrb[13].mxu0  ;;  %v1239_v16 = vpop.f32.mrb[22].mxu1 }
 0x631   : > { %v1193_v17 = vpop.f32.mrb[14].mxu0  ;;  %1266 = vrot.lane.b32.xlu1 %v1726_v11, %s2255_s20  ;;  %v1823_v18 = vpop.f32.mrb[23].mxu1  ;;  %s2795_s20 = sld [smem:[#allocation21_spill]] }
 0x632   : > { %1258 = vrot.lane.b32.xlu0 %v1725_v14, %s2256_s16  ;;  %v1817_v19 = vpop.f32.mrb[15].mxu0 }
 0x637   : > { %s570_s16 = sand.u32 1, %s2795_s20  }
 0x638   : > { %s1677_s23 = sshll.u32 %s570_s16, 3  ;;  %s1527_s21 = scalar_lea.sflag [#allocation8], %s570_s16 }
 0x639   : > { %s572_s15 = scalar_lea.vmem [#allocation15], %s1677_s23 }
 0x63a   : > { %s1541_s30 = sshll.u32 %s572_s15, 4  ;;  %s2695_s30 = int_to_ptr.vmem [resolvable:$true] %s1541_s30 }
 0x63b   : > { %s2146_s25 = scalar_lea.vmem %s2695_s30, 128  ;;  %p2153_p11 = scmp.lt.s32.totalorder %s2695_s30, %s2151_s18 }
 0x63c   : > { %p2147_p1 = scmp.ne.s32.totalorder %s2695_s30, %s2146_s25  ;;  %p2154_p3 = scmp.lt.s32.totalorder %s2152_s19, %s2146_s25 }
 0x63e   : > { %p2148_p8 = pnand %p2147_p1, %p2799_p4  ;;  %p2155_p5 = por %p2154_p3, %p2153_p11 }
 0x640   : > { %p2149_p10 = pneg %p2148_p8 }
 0x642   : > { %p2156_p6 = pnand %p2155_p5, %p2149_p10 }
 0x69b   : > { %v1251_v20 = vpop.permute.xlu1 %1250 }
 0x69c   : > { %1254 = vst.msk [vmem:[#allocation5] sm:$0xf] %vm1253_vm5, %v1251_v20 }
 0x6a3   : > { %v1267_v22 = vpop.permute.xlu1 %1266 }
 0x6a4   : > { %v1259_v21 = vpop.permute.xlu0 %1258 }
 0x6a5   : > { %1262 = vst.msk [vmem:[#allocation5] sm:$0xf] %vm1261_vm6, %v1259_v21 }
 0x6a6   : > { %1270 = vst.msk [vmem:[#allocation5] sm:$0xf] %vm1269_vm7, %v1267_v22 }
 0x6ad   : > { %v1271_v23 = vld [vmem:[#allocation5] sm:$0xf] }
 0x6ae   : > { %1829 = vmatmul.mubr.msk.bf16.vlgmr.msra.gmra.mrb[16].mxu0 %vm584_vm0, %v1271_v23 }
 0x6af   : > { %1848 = vmatprep.mubr.msk.bf16.mxu0 %vm2246_vm1, %v2245_v8  ;;  %1841 = vmatpush3.bf16.msra.mxu0 %v1980_v48 }
 0x6b0   : > { %1842 = vmatprep.subr.bf16.mxu0 %v2245_v8 }
 0x6b3   : > { %1843 = vmatpush3.bf16.msra.mxu0 %v1981_v49 }
 0x6b4   : > { %1844 = vmatprep.subr.bf16.mxu0 %v2245_v8 }
 0x6b7   : > { %1845 = vmatpush3.bf16.msra.mxu0 %v1982_v50 }
 0x6b8   : > { %1846 = vmatprep.subr.bf16.mxu0 %v2245_v8 }
 0x6bb   : > { %1847 = vmatpush3.bf16.msra.mxu0 %v1983_v51 }
 0x781   : > { %v1332_v25 = vpop.f32.mrb[16].mxu0 }
 0x782   : > { %v1333_v26 = vadd.f32 %v1702_v24, %v1332_v25  ;;  %v1830_v28 = vpop.f32.mrb[17].mxu0 }
 0x783   : > { %v1335_v29 = vpop.f32.mrb[18].mxu0 }
 0x784   : > { %v2649_v30 = vadd.f32 %v1333_v26, %v2532_v0  ;;  %v1831_v31 = vpop.f32.mrb[19].mxu0  ;;  %v1979_v0 = vld [vmem:[%s2752_s11 + $0x8] sm:$0xff]  }
 0x785   : > { %1835 = vmatpush3.bf16.msra.mxu1 %v1979_v0 }
 0x786   : > { %v1341_v32 = vsel %vm584_vm0, %v2649_v30, 0.0 }
 0x787   : > { %1342 = vadd.xlane.f32.xlu0 %v1341_v32 }
 0x814   : > { %v1343_v33 = vpop.xlane.xlu0 %1342 }
 0x815   : > { %v1344_v34 = vmul.f32 0.03125, %v1343_v33 }
 0x817   : > { %v1345_v35 = vsub.f32 %v2649_v30, %v1344_v34 }
 0x819   : > { %v1346_v36 = vmul.f32 %v1345_v35, %v1345_v35 }
 0x81b   : > { %v1347_v37 = vsel %vm584_vm0, %v1346_v36, 0.0 }
 0x81c   : > { %1348 = vadd.xlane.f32.xlu1 %v1347_v37 }
 0x8a9   : > { %v1349_v39 = vpop.xlane.xlu1 %1348 }
 0x8aa   : > { %v1350_v40 = vmul.f32 0.03125, %v1349_v39 }
 0x8ac   : > { %v1351_v41 = vadd.f32 1e-06, %v1350_v40 }
 0x8ae   : > { %2002 = vrsqrt.f32 %v1351_v41 }
 0x8b8   : > { %v2003_v42 = vpop.eup %2002 }
 0x8b9   : > { %v1353_v44 = vmul.f32 %v2003_v42, %v1345_v35 }
 0x8bb   : > { %v1360_v46 = vmul.f32 %v1706_v43, %v1353_v44 }
 0x8bd   : > { %v1367_v27 = vadd.f32 %v1707_v45, %v1360_v46 }
 0x8bf   : > { %v1368_v47 = vpack.c.bf16 %v1367_v27, %v1367_v27 }
 0x8c1   : > { %1837 = vmatmul.mubr.msk.bf16.vlgmr.msra.gmra.mrb[24].mxu1 %vm584_vm0, %v1368_v47 }
 0x994   : > { %v1429_v53 = vpop.f32.mrb[24].mxu1 }
 0x995   : > { %v1430_v54 = vadd.f32 %v1708_v52, %v1429_v53  ;;  %v1838_v55 = vpop.f32.mrb[25].mxu1 }
 0x996   : > { %v1432_v56 = vpop.f32.mrb[26].mxu1 }
 0x997   : > { %v1436_v57 = vmul.f32 0.70710677, %v1430_v54  ;;  %v1839_v58 = vpop.f32.mrb[27].mxu1  ;;  %v1435_v8 = vmul.f32 0.5, %v1430_v54 }
 0x999   : > { %2004 = verf.f32 %v1436_v57 }
 0x9a3   : > { %v2005_v59 = vpop.eup %2004 }
 0x9a4   : > { %v1438_v60 = vadd.f32 1.0, %v2005_v59 }
 0x9a6   : > { %v1439_v61 = vmul.f32 %v1438_v60, %v1435_v8 }
 0x9a8   : > { %v1440_v62 = vpack.c.bf16 %v1439_v61, %v1439_v61 }
 0x9aa   : > { %1849 = vmatmul.mubr.msk.bf16.vlgmr.msra.gmra.mrb[20].mxu0 %vm1480_vm8, %v1440_v62 }
 0xa7d   : > { %v1518_v1 = vpop.f32.mrb[20].mxu0 }
 0xa7e   : > { %v1519_v2 = vadd.f32 %v1712_v63, %v1518_v1  ;;  %v1850_v3 = vpop.f32.mrb[21].mxu0 }
 0xa7f   : > { %v1521_v4 = vpop.f32.mrb[22].mxu0 }
 0xa80   : > { %v1524_v5 = vadd.f32 %v1519_v2, %v2649_v30  ;;  %v1851_v6 = vpop.f32.mrb[23].mxu0 }
 0xa82   : > { %1525 = vst.msk [vmem:[%s572_s15] sm:$0xff] %vm584_vm0, %v1524_v5 }
 0xa83   : > { %2159 = shalt.err (!%p2156_p6)
}
 0xa84   : > { %s2160_s20 = scalar_lea.hbm %s2693_s27, 128  ;;  %s2164_s29 = scalar_lea.hbm %s2798_s17, 256 }
 0xa85   : > { %p2161_p7 = scmp.ne.s32.totalorder %s2693_s27, %s2160_s20  ;;  %p2165_p0 = scmp.lt.u32.totalorder %s2693_s27, %s2798_s17 }
 0xa86   : > { %p2166_p2 = scmp.lt.u32.totalorder %s2164_s29, %s2160_s20  ;;  %p2168_p1 = scmp.lt.u32.totalorder %s2160_s20, %s2693_s27 }
 0xa87   : > { %p2162_p9 = pnand %p2161_p7, %p2799_p4 }
 0xa88   : > { %p2167_p13 = por %p2166_p2, %p2165_p0 }
 0xa89   : > { %p2163_p12 = pneg %p2162_p9 }
 0xa8a   : > { %p2169_p8 = por %p2168_p1, %p2167_p13 }
 0xa8c   : > { %p2170_p10 = pnand %p2169_p8, %p2163_p12 }
 0xa8e   : > { %2173 = shalt.err (!%p2170_p10)
}
 0xa8f   : > { %1872 = dma.vmem_to_hbm [thread:$0]  (%p2799_p4), %s2695_s30, 128, %s2693_s27, %s1527_s21  }
 0xa90 PF: > { %s2800_s26 = sld [smem:[#allocation24_spill]]  ;;  %s2801_s15 = sld [smem:[#allocation20_spill]] }
 0xa91   : > { %s2802_s6 = sld [smem:[#allocation27_spill]] }
 0xa96   : > { %p1904_p11 = scmp.ge.s32.totalorder %s2800_s26, 2  ;;  %s1553_s4 = sand.u32 1, %s2801_s15  }
 0xa97   : > { %p2803_p3 = scmp.ne.s32.totalorder %s2802_s6, 0  ;;  %s1554_s25 = scalar_lea.sflag [#allocation8], %s1553_s4 }
 0xa99   : > { %p1891_p5 = pnand %p1904_p11, %p2803_p3 }
 0xa9b   : > { %2211 = dma.done.wait (!%p1891_p5), %s1554_s25, 128  }
 0xa9c   : > { %2213 = vsyncadd (!%p1891_p5), %s1554_s25, 4294967168  ;;  %s31_s23 = sadd.s32 1, %s2800_s26   ;;  %s2804_s18 = sld [smem:[#allocation21_spill]] }
 0xa9d   : > { %p28_p6 = scmp.ge.s32.totalorder %s31_s23, 4   ;;  %s2805_s19 = sld [smem:[#allocation22_spill]] }
 0xa9e   : > { %s2806_s20 = sld [smem:[#allocation28_spill]]  ;;  %s2807_s21 = sld [smem:[#allocation23_spill]] }
 0xa9f   : > { %s2808_s22 = sld [smem:[#allocation25_spill]]  ;;  %30 = sbr.rel (!%p28_p6) target bundleno = 12 (0xc), region = 149 }
 0xaa6   :  { %1559 = vsyncpa [#allocation7], 1 }
 0xaa7   :  { %1561 = vsyncpa [#allocation7 + $0x1], 1 }
 0xaa8   :  { %1562 = vsyncpa [#allocation10], 1 }
 0xaa9   :  { %1563 = vsyncpa [#allocation13], 1 }
 0xaaa   :  { %1564 = vsyncpa [#allocation8], 1 }
 0xaab   :  { %1566 = vsyncpa [#allocation8 + $0x1], 1 }

</bundles_post_ra>
